<compile_context>
chip_gen: v7x
topology: tpu7x:2x2x1
jax: 0.10.0
libtpu: 0.0.40
codegen_flags: <defaults>
</compile_context>

<pallas_src>
import jax
import jax.numpy as jnp
from jax.experimental import pallas as pl
from jax.experimental.pallas import tpu as pltpu


def _make_kernel(L, C, H, Dh, scale, Bt):
    """Kernel over one (Bt, L, C) batch tile; all heads handled in one step."""

    def kernel(x_ref, wd_qkv_ref, wu_qkv_ref, wd_out_ref, wu_out_ref, o_ref):
        # ---- fused LoRA QKV projection for the whole tile -------------------
        x = x_ref[...].reshape(Bt * L, C)                           # (Bt*L, C)
        down = jnp.dot(x, wd_qkv_ref[...],
                       preferred_element_type=jnp.float32)          # (Bt*L, r)
        qkv = jnp.dot(down, wu_qkv_ref[...],
                      preferred_element_type=jnp.float32)           # (Bt*L, 3C)

        # ---- attention, all heads at once per batch ------------------------
        ctx_rows = []
        for b in range(Bt):  # static (small) python unroll; Bt is tiny
            qkv_b = qkv[b * L:(b + 1) * L]                          # (L, 3C)
            # 'L (K H D)' -> (3H, L, D); K outermost matches the torch rearrange.
            qkv_b = qkv_b.reshape(L, 3 * H, Dh).transpose(1, 0, 2)  # (3H, L, Dh)
            q = qkv_b[:H]                                           # (H, L, Dh)
            k = qkv_b[H:2 * H]
            v = qkv_b[2 * H:]

            # scores for all heads in one batched contraction (no k transpose)
            s = jnp.einsum('hqd,hkd->hqk', q, k,
                           preferred_element_type=jnp.float32) * scale
            s = s - jnp.max(s, axis=-1, keepdims=True)
            e = jnp.exp(s)
            p = e * pl.reciprocal(jnp.sum(e, axis=-1, keepdims=True),
                                  approx=True)                      # softmax
            # TODO(synk): attn_drop / proj_drop are identity in forward (p=0.0).

            ctx = jnp.einsum('hqk,hkd->hqd', p, v,
                             preferred_element_type=jnp.float32)    # (H, L, Dh)
            ctx_rows.append(ctx.transpose(1, 0, 2).reshape(L, C))   # 'L (H D)'

        ctx2d = ctx_rows[0] if Bt == 1 else jnp.concatenate(ctx_rows, axis=0)

        # ---- fused LoRA output projection -----------------------------------
        mid = jnp.dot(ctx2d, wd_out_ref[...],
                      preferred_element_type=jnp.float32)           # (Bt*L, r)
        out = jnp.dot(mid, wu_out_ref[...],
                      preferred_element_type=jnp.float32)           # (Bt*L, C)
        o_ref[...] = out.reshape(Bt, L, C).astype(o_ref.dtype)

    return kernel


def lora_attention_pallas(x, params, *, num_heads, rank, network_alpha=None,
                          block_b=1):
    """x: (B, L, C) -> (B, L, C). Weights stored as (in_features, out_features)."""
    B, L, C = x.shape
    assert C % num_heads == 0, "hidden dim must be divisible by num_heads"
    assert B % block_b == 0
    Dh = C // num_heads
    scale = float(Dh) ** (-0.5)            # qk_scale or head_dim ** -0.5

    # Fold the LoRA alpha/rank scaling into the up-projection weights
    # (forward-equivalent; avoids an extra in-kernel multiply).
    if network_alpha is None:
        wu_qkv, wu_out = params["qkv_up"], params["out_up"]
    else:
        s_lora = float(network_alpha) / float(rank)
        wu_qkv, wu_out = params["qkv_up"] * s_lora, params["out_up"] * s_lora

    kernel = _make_kernel(L, C, num_heads, Dh, scale, block_b)

    return pl.pallas_call(
        kernel,
        out_shape=jax.ShapeDtypeStruct((B, L, C), x.dtype),
        grid_spec=pltpu.PrefetchScalarGridSpec(
            num_scalar_prefetch=0,
            grid=(B // block_b,),
            in_specs=[
                # activations: one (block_b, L, C) tile per grid step
                pl.BlockSpec((block_b, L, C), lambda i: (i, 0, 0)),
                # LoRA weights: full blocks, constant index_map -> DMA'd once,
                # resident in VMEM across all grid steps.
                pl.BlockSpec((C, rank),     lambda i: (0, 0)),   # qkv down
                pl.BlockSpec((rank, 3 * C), lambda i: (0, 0)),   # qkv up
                pl.BlockSpec((C, rank),     lambda i: (0, 0)),   # out down
                pl.BlockSpec((rank, C),     lambda i: (0, 0)),   # out up
            ],
            out_specs=pl.BlockSpec((block_b, L, C), lambda i: (i, 0, 0)),
        ),
        compiler_params=pltpu.CompilerParams(
            dimension_semantics=("parallel",)),
    )(x, params["qkv_down"], wu_qkv, params["out_down"], wu_out)


def ref_forward(x, p, *, num_heads, rank, network_alpha=None):
    """Pure-JAX reference mirroring the PyTorch 'math' path (forward only)."""
    B, L, C = x.shape
    H, Dh = num_heads, C // num_heads
    scale = float(Dh) ** (-0.5)
    s_lora = 1.0 if network_alpha is None else float(network_alpha) / float(rank)

    qkv = ((x @ p["qkv_down"]) @ p["qkv_up"]) * s_lora          # (B, L, 3C)
    qkv = qkv.reshape(B, L, 3, H, Dh).transpose(2, 0, 3, 1, 4)  # (3, B, H, L, Dh)
    q, k, v = qkv[0], qkv[1], qkv[2]
    attn = jnp.einsum("bhqd,bhkd->bhqk", q, k) * scale
    attn = jax.nn.softmax(attn, axis=-1)
    ctx = jnp.einsum("bhqk,bhkd->bhqd", attn, v)
    ctx = ctx.transpose(0, 2, 1, 3).reshape(B, L, C)
    return ((ctx @ p["out_down"]) @ p["out_up"]) * s_lora


if __name__ == "__main__":
    # Small shapes consistent with the module: dim divisible by num_heads,
    # head_dim = 128 (lane-aligned), LoRA rank = 24 (module default),
    # network_alpha = None (LoraAttention default).
    B, L, C = 2, 16, 512
    num_heads, rank = 4, 24
    network_alpha = None

    key = jax.random.PRNGKey(0)
    k0, k1, k2, k3, k4 = jax.random.split(key, 5)

    # NOTE: the PyTorch __init__ zeros the LoRA "up" weights (a degenerate
    # all-zero forward), so we use small deterministic random "up" weights of
    # the same shapes to actually exercise the kernel; "down" weights follow
    # the spec's normal(std=1/rank) init. Weights are stored (in, out) so that
    # y = x @ W (transposed vs. torch.nn.Linear storage).
    params = {
        "qkv_down": (jax.random.normal(k0, (C, rank)) / rank).astype(jnp.float32),
        "qkv_up":   (0.2 * jax.random.normal(k1, (rank, 3 * C))).astype(jnp.float32),
        "out_down": (jax.random.normal(k2, (C, rank)) / rank).astype(jnp.float32),
        "out_up":   (0.2 * jax.random.normal(k3, (rank, C))).astype(jnp.float32),
    }
    x = jax.random.normal(k4, (B, L, C), dtype=jnp.float32)

    out = lora_attention_pallas(x, params, num_heads=num_heads, rank=rank,
                                network_alpha=network_alpha, block_b=1)
    out = jax.block_until_ready(out)

    ref = ref_forward(x, params, num_heads=num_heads, rank=rank,
                      network_alpha=network_alpha)
    assert out.shape == (B, L, C)
    max_err = float(jnp.max(jnp.abs(out - ref)))
    # Tolerance accommodates the approximate (EUP) reciprocal in the softmax.
    assert jnp.allclose(out, ref, atol=1e-2, rtol=1e-2), max_err
    print("KERNEL_OK")
</pallas_src>

<mosaic_0001>
module attributes {stable_mosaic.version = 11 : i64} {
  func.func @kernel(%arg0: i32, %arg1: memref<1x16x512xf32, #tpu.memory_space<vmem>>, %arg2: memref<512x24xf32, #tpu.memory_space<vmem>>, %arg3: memref<24x1536xf32, #tpu.memory_space<vmem>>, %arg4: memref<512x24xf32, #tpu.memory_space<vmem>>, %arg5: memref<24x512xf32, #tpu.memory_space<vmem>>, %arg6: memref<1x16x512xf32, #tpu.memory_space<vmem>>) attributes {dimension_semantics = [#tpu.dimension_semantics<parallel>], iteration_bounds = array<i64: 2>, scalar_prefetch = 0 : i64, scratch_operands = 0 : i64, tpu.core_type = #tpu.core_type<tc>, window_params = [{transform_indices = @transform_0, window_bounds = array<i64: 1, 16, 512>}, {pipeline_mode = #tpu.pipeline_mode<synchronous>, transform_indices = @transform_1, window_bounds = array<i64: 512, 24>}, {pipeline_mode = #tpu.pipeline_mode<synchronous>, transform_indices = @transform_2, window_bounds = array<i64: 24, 1536>}, {pipeline_mode = #tpu.pipeline_mode<synchronous>, transform_indices = @transform_3, window_bounds = array<i64: 512, 24>}, {pipeline_mode = #tpu.pipeline_mode<synchronous>, transform_indices = @transform_4, window_bounds = array<i64: 24, 512>}, {transform_indices = @transform_5, window_bounds = array<i64: 1, 16, 512>}]} {
    %c0 = arith.constant 0 : index
    %c0_0 = arith.constant 0 : index
    %c0_1 = arith.constant 0 : index
    %0 = vector.load %arg1[%c0, %c0_0, %c0_1] : memref<1x16x512xf32, #tpu.memory_space<vmem>>, vector<1x16x512xf32>
    %1 = vector.shape_cast %0 : vector<1x16x512xf32> to vector<16x512xf32>
    %c0_2 = arith.constant 0 : index
    %c0_3 = arith.constant 0 : index
    %2 = vector.load %arg2[%c0_2, %c0_3] : memref<512x24xf32, #tpu.memory_space<vmem>>, vector<512x24xf32>
    %cst = arith.constant dense<0.000000e+00> : vector<16x24xf32>
    %3 = tpu.matmul %1, %2, %cst {dimension_numbers = #tpu.dot_dimension_numbers<[1], [0], [0], [1], [0, 0, 1, 1], [], []>} : vector<16x512xf32>, vector<512x24xf32>, vector<16x24xf32> -> vector<16x24xf32>
    %c0_4 = arith.constant 0 : index
    %c0_5 = arith.constant 0 : index
    %4 = vector.load %arg3[%c0_4, %c0_5] : memref<24x1536xf32, #tpu.memory_space<vmem>>, vector<24x1536xf32>
    %cst_6 = arith.constant dense<0.000000e+00> : vector<16x1536xf32>
    %5 = tpu.matmul %3, %4, %cst_6 {dimension_numbers = #tpu.dot_dimension_numbers<[1], [0], [0], [1], [0, 0, 1, 1], [], []>} : vector<16x24xf32>, vector<24x1536xf32>, vector<16x1536xf32> -> vector<16x1536xf32>
    %6 = vector.shape_cast %5 : vector<16x1536xf32> to vector<16x12x128xf32>
    %7 = tpu.transpose %6, [1, 0, 2] : vector<16x12x128xf32> -> vector<12x16x128xf32>
    %8 = vector.extract_strided_slice %7 {offsets = [0, 0, 0], sizes = [4, 16, 128], strides = [1, 1, 1]} : vector<12x16x128xf32> to vector<4x16x128xf32>
    %9 = vector.extract_strided_slice %7 {offsets = [4, 0, 0], sizes = [4, 16, 128], strides = [1, 1, 1]} : vector<12x16x128xf32> to vector<4x16x128xf32>
    %10 = vector.extract_strided_slice %7 {offsets = [8, 0, 0], sizes = [4, 16, 128], strides = [1, 1, 1]} : vector<12x16x128xf32> to vector<4x16x128xf32>
    "tpu.trace_start"() <{level = 10 : i32, message = "hqd,hkd->hqk"}> : () -> ()
    %cst_7 = arith.constant dense<0.000000e+00> : vector<4x16x16xf32>
    %11 = tpu.matmul %8, %9, %cst_7 {dimension_numbers = #tpu.dot_dimension_numbers<[2], [2], [1], [1], [0, 0, 0, 1, 1, 1], [0], [0]>} : vector<4x16x128xf32>, vector<4x16x128xf32>, vector<4x16x16xf32> -> vector<4x16x16xf32>
    "tpu.trace_stop"() : () -> ()
    %cst_8 = arith.constant 0.0883883461 : f32
    %12 = vector.broadcast %cst_8 : f32 to vector<4x16x16xf32>
    %13 = arith.mulf %11, %12 : vector<4x16x16xf32>
    %cst_9 = arith.constant dense<0xFF800000> : vector<4x16xf32>
    %14 = vector.multi_reduction <maximumf>, %13, %cst_9 [2] : vector<4x16x16xf32> to vector<4x16xf32>
    %15 = vector.shape_cast %14 : vector<4x16xf32> to vector<4x16x1xf32>
    %16 = vector.broadcast %15 : vector<4x16x1xf32> to vector<4x16x16xf32>
    %17 = arith.subf %13, %16 : vector<4x16x16xf32>
    %18 = math.exp %17 : vector<4x16x16xf32>
    %cst_10 = arith.constant dense<0.000000e+00> : vector<4x16xf32>
    %19 = vector.multi_reduction <add>, %18, %cst_10 [2] : vector<4x16x16xf32> to vector<4x16xf32>
    %20 = vector.shape_cast %19 : vector<4x16xf32> to vector<4x16x1xf32>
    %21 = tpu.reciprocal %20 {approx = true} : vector<4x16x1xf32> -> vector<4x16x1xf32>
    %22 = vector.broadcast %21 : vector<4x16x1xf32> to vector<4x16x16xf32>
    %23 = arith.mulf %18, %22 : vector<4x16x16xf32>
    "tpu.trace_start"() <{level = 10 : i32, message = "hqk,hkd->hqd"}> : () -> ()
    %cst_11 = arith.constant dense<0.000000e+00> : vector<4x16x128xf32>
    %24 = tpu.matmul %23, %10, %cst_11 {dimension_numbers = #tpu.dot_dimension_numbers<[2], [1], [1], [2], [0, 0, 0, 1, 1, 2], [0], [0]>} : vector<4x16x16xf32>, vector<4x16x128xf32>, vector<4x16x128xf32> -> vector<4x16x128xf32>
    "tpu.trace_stop"() : () -> ()
    %25 = tpu.transpose %24, [1, 0, 2] : vector<4x16x128xf32> -> vector<16x4x128xf32>
    %26 = vector.shape_cast %25 : vector<16x4x128xf32> to vector<16x512xf32>
    %c0_12 = arith.constant 0 : index
    %c0_13 = arith.constant 0 : index
    %27 = vector.load %arg4[%c0_12, %c0_13] : memref<512x24xf32, #tpu.memory_space<vmem>>, vector<512x24xf32>
    %cst_14 = arith.constant dense<0.000000e+00> : vector<16x24xf32>
    %28 = tpu.matmul %26, %27, %cst_14 {dimension_numbers = #tpu.dot_dimension_numbers<[1], [0], [0], [1], [0, 0, 1, 1], [], []>} : vector<16x512xf32>, vector<512x24xf32>, vector<16x24xf32> -> vector<16x24xf32>
    %c0_15 = arith.constant 0 : index
    %c0_16 = arith.constant 0 : index
    %29 = vector.load %arg5[%c0_15, %c0_16] : memref<24x512xf32, #tpu.memory_space<vmem>>, vector<24x512xf32>
    %cst_17 = arith.constant dense<0.000000e+00> : vector<16x512xf32>
    %30 = tpu.matmul %28, %29, %cst_17 {dimension_numbers = #tpu.dot_dimension_numbers<[1], [0], [0], [1], [0, 0, 1, 1], [], []>} : vector<16x24xf32>, vector<24x512xf32>, vector<16x512xf32> -> vector<16x512xf32>
    %31 = vector.shape_cast %30 : vector<16x512xf32> to vector<1x16x512xf32>
    %c0_18 = arith.constant 0 : index
    %c0_19 = arith.constant 0 : index
    %c0_20 = arith.constant 0 : index
    %32 = vector.load %arg6[%c0_18, %c0_19, %c0_20] : memref<1x16x512xf32, #tpu.memory_space<vmem>>, vector<1x16x512xf32>
    tpu.vector_store %arg6[%c0_18, %c0_19, %c0_20], %31 {strides = array<i32>} : memref<1x16x512xf32, #tpu.memory_space<vmem>>, vector<1x16x512xf32>,
    return
  }
  func.func @transform_0(%arg0: i32) -> (i32, i32, i32) {
    %c0_i32 = arith.constant 0 : i32
    %c0_i32_0 = arith.constant 0 : i32
    %c0_i32_1 = arith.constant 0 : i32
    return %arg0, %c0_i32, %c0_i32_0 : i32, i32, i32
  }
  func.func @transform_1(%arg0: i32) -> (i32, i32) {
    %c0_i32 = arith.constant 0 : i32
    %c0_i32_0 = arith.constant 0 : i32
    %c0_i32_1 = arith.constant 0 : i32
    return %c0_i32, %c0_i32_0 : i32, i32
  }
  func.func @transform_2(%arg0: i32) -> (i32, i32) {
    %c0_i32 = arith.constant 0 : i32
    %c0_i32_0 = arith.constant 0 : i32
    %c0_i32_1 = arith.constant 0 : i32
    return %c0_i32, %c0_i32_0 : i32, i32
  }
  func.func @transform_3(%arg0: i32) -> (i32, i32) {
    %c0_i32 = arith.constant 0 : i32
    %c0_i32_0 = arith.constant 0 : i32
    %c0_i32_1 = arith.constant 0 : i32
    return %c0_i32, %c0_i32_0 : i32, i32
  }
  func.func @transform_4(%arg0: i32) -> (i32, i32) {
    %c0_i32 = arith.constant 0 : i32
    %c0_i32_0 = arith.constant 0 : i32
    %c0_i32_1 = arith.constant 0 : i32
    return %c0_i32, %c0_i32_0 : i32, i32
  }
  func.func @transform_5(%arg0: i32) -> (i32, i32, i32) {
    %c0_i32 = arith.constant 0 : i32
    %c0_i32_0 = arith.constant 0 : i32
    %c0_i32_1 = arith.constant 0 : i32
    return %arg0, %c0_i32, %c0_i32_0 : i32, i32, i32
  }
}

</mosaic_0001>

<bundles_post_ra>
// kernel: tpu_custom_call.1
= control target key start
LH: loop header
LB: loop body
LE: loop exit
PB: predicated region body
PF: predicated region fallthrough
CT: control target
= control target key end

     0   :  { %10 = vsyncpa [#allocation3], 0  ;;  %s4879_s0 = inlined_call_operand.vmem [shape: f32[2,16,512], index: 0, kind: input, shape index: {}]   ;;  %s4880_s1 = inlined_call_operand.vmem [shape: f32[512,24], index: 1, kind: input, shape index: {}]   ;;  %s4881_s2 = inlined_call_operand.vmem [shape: f32[24,1536], index: 2, kind: input, shape index: {}]   ;;  %s4882_s3 = inlined_call_operand.vmem [shape: f32[512,24], index: 3, kind: input, shape index: {}]   ;;  %s4883_s4 = inlined_call_operand.vmem [shape: f32[24,512], index: 4, kind: input, shape index: {}]   ;;  %s4884_s5 = inlined_call_operand.hbm [shape: f32[2,16,512], index: 5, kind: output, shape index: {}]  }
   0x1   :  { %12 = vsyncpa [#allocation3 + $0x1], 0  ;;  %s3899_s18 = smov 0   ;;  %s3901_s19 = smov 0  }
   0x2   :  { %s3903_s20 = smov 0   ;;  %s3905_s21 = smov 0  }
   0x3 LB: > { %s3920_s22 = sadd.s32 4294967295, %s3861_s21   ;;  %s3229_s23 = sadd.s32 4294967294, %s3861_s21   ;;  %s3861_s21 = sphi %s3905_s21, %s4890_s21   ;;  %s3857_s20 = sphi %s3903_s20, %s4889_s20   ;;  %s3853_s19 = sphi %s3901_s19, %s4888_s19   ;;  %s3849_s18 = sphi %s3899_s18, %s4887_s18  }
   0x4   : > { %s3924_s24 = sadd.s32 1, %s3861_s21   ;;  %s135_s25 = sadd.s32 1, %s3857_s20 }
   0x5   : > { %s132_s26 = ssub.s32 %s3861_s21, %s3924_s24  ;;  %p145_p0 = scmp.ne.s32.totalorder %s3857_s20, %s3853_s19 }
   0x6   : > { %p133_p1 = scmp.eq.s32.totalorder %s132_s26, 0  ;;  %p146_p2 = scmp.eq.s32.totalorder %s3920_s22, 1 }
   0x7   : > { %p151_p3 = scmp.ne.s32.totalorder %s3853_s19, %s3849_s18  ;;  %p152_p4 = scmp.eq.s32.totalorder %s3229_s23, 1 }
   0x8   : > { %s3935_s27 = scalar_select %p133_p1, %s3857_s20, %s135_s25  }
   0x9   : > { %p3937_p5 = por %p146_p2, %p145_p0  ;;  %p3941_p6 = por %p152_p4, %p151_p3 }
   0xa   : > { %p3232_p7 = scmp.ge.s32.totalorder %s3861_s21, 1  ;;  %p190_p8 = scmp.lt.s32.totalorder %s3861_s21, 3 }
   0xc   : > { %p191_p9 = pnand %p3232_p7, %p190_p8 }
   0xd   : > { %v247_v0 = vld [vmem:[%s4880_s1 + $0x80] sm:$0xff] (!%p191_p9)  ;;  %v248_v1 = vld [vmem:[%s4880_s1 + $0x88] sm:$0xff] (!%p191_p9)  ;;  %v249_v11 = vld [vmem:[%s4880_s1 + $0x90] sm:$0xff] (!%p191_p9)  ;;  %p218_p10 = scmp.lt.s32.totalorder (!%p191_p9), %s3920_s22, 1  ;;  %vm481_vm0 = vcmask (!%p191_p9), 195584   ;;  %vm2074_vm1 = vcmask (!%p191_p9), 130048  }
   0xe   : > { %194 = sbr.rel (%p191_p9) target bundleno = 1755 (0x6db), region = 40  ;;  %v279_v2 = vld [vmem:[%s4880_s1 + $0x180] sm:$0xff] (!%p191_p9)  ;;  %v3531_v3 = vpack.c.bf16 (!%p191_p9), %v248_v1, %v247_v0  ;;  %v280_v4 = vld [vmem:[%s4880_s1 + $0x188] sm:$0xff] (!%p191_p9)  ;;  %v250_v13 = vld [vmem:[%s4880_s1 + $0x98] sm:$0xff] (!%p191_p9)  ;;  %s215_s12 = sand.u32 (!%p191_p9), 1, %s3853_s19  }
   0xf   : > { %v231_v5 = vld [vmem:[%s4880_s1] sm:$0xff] (!%p191_p9)  ;;  %v232_v6 = vld [vmem:[%s4880_s1 + $0x8] sm:$0xff] (!%p191_p9)  ;;  %v3563_v7 = vpack.c.bf16 (!%p191_p9), %v280_v4, %v279_v2  ;;  %v281_v14 = vld [vmem:[%s4880_s1 + $0x190] sm:$0xff] (!%p191_p9)  ;;  %v3535_v16 = vpack.c.bf16 (!%p191_p9), %v250_v13, %v249_v11  ;;  %s3233_s16 = sshll.u32 (!%p191_p9), %s215_s12, 6  ;;  %s3290_s25 = sshll.u32 (!%p191_p9), %s3920_s22, 10 }
  0x10   : > { %v3533_v8 = vpack.c.bf16 (!%p191_p9), %v232_v6, %v231_v5  ;;  %v263_v9 = vld [vmem:[%s4880_s1 + $0x100] sm:$0xff] (!%p191_p9)  ;;  %v264_v10 = vld [vmem:[%s4880_s1 + $0x108] sm:$0xff] (!%p191_p9)  ;;  %3532 = vmatprep.subr.bf16.mxu0 (!%p191_p9), %v3531_v3  ;;  %v282_v15 = vld [vmem:[%s4880_s1 + $0x198] sm:$0xff] (!%p191_p9)  ;;  %s217_s17 = scalar_lea.vmem (!%p191_p9), [#allocation2], %s3233_s16  ;;  %s3866_s6 = smov (!%p191_p9), [#allocation2]  }
  0x11   : > { %v3565_v12 = vpack.c.bf16 (!%p191_p9), %v264_v10, %v263_v9  ;;  %3564 = vmatprep.subr.bf16.mxu1 (!%p191_p9), %v3563_v7  ;;  %v3567_v17 = vpack.c.bf16 (!%p191_p9), %v282_v15, %v281_v14  ;;  %v233_v18 = vld [vmem:[%s4880_s1 + $0x10] sm:$0xff] (!%p191_p9)  ;;  %v234_v19 = vld [vmem:[%s4880_s1 + $0x18] sm:$0xff] (!%p191_p9)  ;;  %v251_v23 = vld [vmem:[%s4880_s1 + $0xa0] sm:$0xff] (!%p191_p9)  ;;  %s3167_s23 = sshll.u32 (!%p191_p9), %s217_s17, 4  ;;  %s4831_s23 = int_to_ptr.vmem [resolvable:$true] %s3167_s23 }
  0x12   : > { %3534 = vmatpush3.bf16.msra.mxu0 (!%p191_p9), %v3533_v8  ;;  %v265_v20 = vld [vmem:[%s4880_s1 + $0x110] sm:$0xff] (!%p191_p9)  ;;  %v3537_v21 = vpack.c.bf16 (!%p191_p9), %v234_v19, %v233_v18  ;;  %v266_v22 = vld [vmem:[%s4880_s1 + $0x118] sm:$0xff] (!%p191_p9)  ;;  %v252_v24 = vld [vmem:[%s4880_s1 + $0xa8] sm:$0xff] (!%p191_p9) }
  0x13   : > { %3566 = vmatpush3.bf16.msra.mxu1 (!%p191_p9), %v3565_v12  ;;  %3536 = vmatprep.subr.bf16.mxu0 (!%p191_p9), %v3535_v16  ;;  %v3569_v25 = vpack.c.bf16 (!%p191_p9), %v266_v22, %v265_v20  ;;  %v3539_v26 = vpack.c.bf16 (!%p191_p9), %v252_v24, %v251_v23  ;;  %v283_v27 = vld [vmem:[%s4880_s1 + $0x1a0] sm:$0xff] (!%p191_p9)  ;;  %v284_v28 = vld [vmem:[%s4880_s1 + $0x1a8] sm:$0xff] (!%p191_p9)  ;;  %v253_v35 = vld [vmem:[%s4880_s1 + $0xb0] sm:$0xff] (!%p191_p9) }
  0x14   : > { %3568 = vmatprep.subr.bf16.mxu1 (!%p191_p9), %v3567_v17  ;;  %v235_v29 = vld [vmem:[%s4880_s1 + $0x20] sm:$0xff] (!%p191_p9)  ;;  %v3571_v30 = vpack.c.bf16 (!%p191_p9), %v284_v28, %v283_v27  ;;  %v236_v31 = vld [vmem:[%s4880_s1 + $0x28] sm:$0xff] (!%p191_p9)  ;;  %v254_v36 = vld [vmem:[%s4880_s1 + $0xb8] sm:$0xff] (!%p191_p9) }
  0x15   : > { %v267_v32 = vld [vmem:[%s4880_s1 + $0x120] sm:$0xff]  ;;  %v268_v33 = vld [vmem:[%s4880_s1 + $0x128] sm:$0xff]  ;;  %v3541_v34 = vpack.c.bf16 %v236_v31, %v235_v29  ;;  %v285_v37 = vld [vmem:[%s4880_s1 + $0x1b0] sm:$0xff]  ;;  %v3543_v39 = vpack.c.bf16 %v254_v36, %v253_v35  ;;  %s4059_s13 = scalar_select %p218_p10, %s3920_s22, 1 }
  0x16   : > { %3538 = vmatpush3.bf16.msra.mxu0 %v3537_v21  ;;  %v3573_v38 = vpack.c.bf16 %v268_v33, %v267_v32  ;;  %v286_v40 = vld [vmem:[%s4880_s1 + $0x1b8] sm:$0xff]  ;;  %v237_v41 = vld [vmem:[%s4880_s1 + $0x30] sm:$0xff]  ;;  %v255_v46 = vld [vmem:[%s4880_s1 + $0xc0] sm:$0xff]  ;;  %s4838_s22 = scalar_lea.sflag [#allocation3], %s215_s12 }
  0x17   : > { %3570 = vmatpush3.bf16.msra.mxu1 %v3569_v25  ;;  %3540 = vmatprep.subr.bf16.mxu0 %v3539_v26  ;;  %v238_v42 = vld [vmem:[%s4880_s1 + $0x38] sm:$0xff]  ;;  %v3575_v43 = vpack.c.bf16 %v286_v40, %v285_v37  ;;  %v269_v44 = vld [vmem:[%s4880_s1 + $0x130] sm:$0xff]  ;;  %v256_v47 = vld [vmem:[%s4880_s1 + $0xc8] sm:$0xff]  ;;  %s3289_s15 = sshll.u32 %s4059_s13, 6  ;;  %s3799_s13 = scalar_lea.vmem %s4831_s23, 1024 }
  0x18   : > { %3572 = vmatprep.subr.bf16.mxu1 %v3571_v30  ;;  %v270_v45 = vld [vmem:[%s4880_s1 + $0x138] sm:$0xff]  ;;  %v287_v48 = vld [vmem:[%s4880_s1 + $0x1c0] sm:$0xff]  ;;  %v288_v49 = vld [vmem:[%s4880_s1 + $0x1c8] sm:$0xff]  ;;  %v3545_v50 = vpack.c.bf16 %v238_v42, %v237_v41  ;;  %v3547_v52 = vpack.c.bf16 %v256_v47, %v255_v46  ;;  %s4107_s14 = scalar_lea.vmem %s4879_s0, %s3289_s15  ;;  %p3800_p11 = scmp.ne.s32.totalorder %s4831_s23, %s3799_s13 }
  0x19   : > { %v3577_v51 = vpack.c.bf16 %v270_v45, %v269_v44  ;;  %v239_v53 = vld [vmem:[%s4880_s1 + $0x40] sm:$0xff]  ;;  %v240_v54 = vld [vmem:[%s4880_s1 + $0x48] sm:$0xff]  ;;  %v3579_v56 = vpack.c.bf16 %v288_v49, %v287_v48  ;;  %v257_v58 = vld [vmem:[%s4880_s1 + $0xd0] sm:$0xff]  ;;  %s3803_s15 = sshll.u32 %s3866_s6, 4  ;;  %s3804_s15 = int_to_ptr.vmem [resolvable:$false] %s3803_s15 }
  0x1a   : > { %3542 = vmatpush3.bf16.msra.mxu0 %v3541_v34  ;;  %v271_v55 = vld [vmem:[%s4880_s1 + $0x140] sm:$0xff]  ;;  %v272_v57 = vld [vmem:[%s4880_s1 + $0x148] sm:$0xff]  ;;  %v258_v59 = vld [vmem:[%s4880_s1 + $0xd8] sm:$0xff]  ;;  %v3549_v62 = vpack.c.bf16 %v240_v54, %v239_v53  ;;  %p3801_p12 = pnand %p3800_p11, %p3937_p5  ;;  %s3805_s7 = scalar_lea.vmem %s3804_s15, 2048 }
  0x1b   : > { %3574 = vmatpush3.bf16.msra.mxu1 %v3573_v38  ;;  %3544 = vmatprep.subr.bf16.mxu0 %v3543_v39  ;;  %v289_v60 = vld [vmem:[%s4880_s1 + $0x1d0] sm:$0xff]  ;;  %v290_v61 = vld [vmem:[%s4880_s1 + $0x1d8] sm:$0xff]  ;;  %v3581_v63 = vpack.c.bf16 %v272_v57, %v271_v55  ;;  %v3551_v0 = vpack.c.bf16 %v258_v59, %v257_v58  ;;  %v259_v6 = vld [vmem:[%s4880_s1 + $0xe0] sm:$0xff]  ;;  %v3863_v59 = vmov 0.0   ;;  %p3806_p0 = scmp.lt.s32.totalorder %s4831_s23, %s3804_s15  ;;  %p3807_p1 = scmp.lt.s32.totalorder %s3805_s7, %s3799_s13 }
  0x1c   : > { %3576 = vmatprep.subr.bf16.mxu1 %v3575_v43  ;;  %v241_v1 = vld [vmem:[%s4880_s1 + $0x50] sm:$0xff]  ;;  %v242_v2 = vld [vmem:[%s4880_s1 + $0x58] sm:$0xff]  ;;  %v3583_v4 = vpack.c.bf16 %v290_v61, %v289_v60  ;;  %v260_v7 = vld [vmem:[%s4880_s1 + $0xe8] sm:$0xff]  ;;  %p3802_p13 = pneg %p3801_p12 }
  0x1d   : > { %v273_v3 = vld [vmem:[%s4880_s1 + $0x150] sm:$0xff]  ;;  %v274_v5 = vld [vmem:[%s4880_s1 + $0x158] sm:$0xff]  ;;  %v291_v8 = vld [vmem:[%s4880_s1 + $0x1e0] sm:$0xff]  ;;  %v3553_v10 = vpack.c.bf16 %v242_v2, %v241_v1  ;;  %v3555_v14 = vpack.c.bf16 %v260_v7, %v259_v6  ;;  %p3808_p2 = por %p3807_p1, %p3806_p0 }
  0x1e   : > { %3546 = vmatpush3.bf16.msra.mxu0 %v3545_v50  ;;  %v292_v9 = vld [vmem:[%s4880_s1 + $0x1e8] sm:$0xff]  ;;  %v243_v11 = vld [vmem:[%s4880_s1 + $0x60] sm:$0xff]  ;;  %v3585_v13 = vpack.c.bf16 %v274_v5, %v273_v3  ;;  %v226_v17 = vld [vmem:[%s4107_s14 + $0x18] sm:$0xff] }
  0x1f   : > { %3578 = vmatpush3.bf16.msra.mxu1 %v3577_v51  ;;  %3548 = vmatprep.subr.bf16.mxu0 %v3547_v52  ;;  %v244_v12 = vld [vmem:[%s4880_s1 + $0x68] sm:$0xff]  ;;  %v275_v15 = vld [vmem:[%s4880_s1 + $0x160] sm:$0xff]  ;;  %v3587_v18 = vpack.c.bf16 %v292_v9, %v291_v8  ;;  %v261_v20 = vld [vmem:[%s4880_s1 + $0xf0] sm:$0xff]  ;;  %p3809_p3 = pnand %p3808_p2, %p3802_p13 }
  0x20   : > { %3580 = vmatprep.subr.bf16.mxu1 %v3579_v56  ;;  %v224_v16 = vld [vmem:[%s4107_s14 + $0x8] sm:$0xff]  ;;  %v262_v21 = vld [vmem:[%s4880_s1 + $0xf8] sm:$0xff]  ;;  %v293_v22 = vld [vmem:[%s4880_s1 + $0x1f0] sm:$0xff]  ;;  %434 = vmatprep.mubr.f32.mxu1 %v226_v17  ;;  %v3557_v24 = vpack.c.bf16 %v244_v12, %v243_v11 }
  0x21   : > { %v276_v19 = vld [vmem:[%s4880_s1 + $0x168] sm:$0xff]  ;;  %359 = vmatprep.mubr.f32.mxu0 %v224_v16  ;;  %v294_v23 = vld [vmem:[%s4880_s1 + $0x1f8] sm:$0xff]  ;;  %v3559_v26 = vpack.c.bf16 %v262_v21, %v261_v20  ;;  %v245_v27 = vld [vmem:[%s4880_s1 + $0x70] sm:$0xff] }
  0x22   : > { %3550 = vmatpush3.bf16.msra.mxu0 %v3549_v62  ;;  %v3589_v25 = vpack.c.bf16 %v276_v19, %v275_v15  ;;  %v246_v28 = vld [vmem:[%s4880_s1 + $0x78] sm:$0xff]  ;;  %v277_v29 = vld [vmem:[%s4880_s1 + $0x170] sm:$0xff]  ;;  %v3591_v30 = vpack.c.bf16 %v294_v23, %v293_v22  ;;  %v446_v32 = vld [vmem:[%s4881_s2 + $0x8] sm:$0xff] }
  0x23   : > { %3582 = vmatpush3.bf16.msra.mxu1 %v3581_v63  ;;  %3552 = vmatprep.subr.bf16.mxu0 %v3551_v0  ;;  %v278_v31 = vld [vmem:[%s4880_s1 + $0x178] sm:$0xff]  ;;  %v458_v33 = vld [vmem:[%s4881_s2 + $0x68] sm:$0xff]  ;;  %v3561_v36 = vpack.c.bf16 %v246_v28, %v245_v27  ;;  %v445_v40 = vld [vmem:[%s4881_s2] sm:$0xff] }
  0x24   : > { %3584 = vmatprep.subr.bf16.mxu1 %v3583_v4  ;;  %v448_v34 = vld [vmem:[%s4881_s2 + $0x18] sm:$0xff]  ;;  %v3593_v37 = vpack.c.bf16 %v278_v31, %v277_v29  ;;  %v3595_v38 = vpack.c.bf16 %v458_v33, %v446_v32  ;;  %v457_v41 = vld [vmem:[%s4881_s2 + $0x60] sm:$0xff]  ;;  %v447_v42 = vld [vmem:[%s4881_s2 + $0x10] sm:$0xff] }
  0x25   : > { %v460_v35 = vld [vmem:[%s4881_s2 + $0x78] sm:$0xff]  ;;  %v459_v43 = vld [vmem:[%s4881_s2 + $0x70] sm:$0xff]  ;;  %v223_v44 = vld [vmem:[%s4107_s14] sm:$0xff]  ;;  %v3597_v47 = vpack.c.bf16 %v457_v41, %v445_v40  ;;  %v955_v41 = vlaneseq }
  0x26   : > { %3554 = vmatpush3.bf16.msra.mxu0 %v3553_v10  ;;  %v3599_v39 = vpack.c.bf16 %v460_v35, %v448_v34  ;;  %v225_v45 = vld [vmem:[%s4107_s14 + $0x10] sm:$0xff]  ;;  %v228_v46 = vld [vmem:[%s4107_s14 + $0x28] sm:$0xff]  ;;  %v230_v48 = vld [vmem:[%s4107_s14 + $0x38] sm:$0xff]  ;;  %v3601_v49 = vpack.c.bf16 %v459_v43, %v447_v42 }
  0x27   : > { %3586 = vmatpush3.bf16.msra.mxu1 %v3585_v13  ;;  %3556 = vmatprep.subr.bf16.mxu0 %v3555_v14  ;;  %v227_v50 = vld [vmem:[%s4107_s14 + $0x20] sm:$0xff]  ;;  %v229_v51 = vld [vmem:[%s4107_s14 + $0x30] sm:$0xff]  ;;  %v470_v52 = vld [vmem:[%s4881_s2 + $0xc8] sm:$0xff]  ;;  %v956_v43 = vshrl.u32 %v955_v41, 7  ;;  %s4836_s14 = scalar_lea.hbm %s4884_s5, %s3290_s25 }
  0x28   : > { %3588 = vmatprep.subr.bf16.mxu1 %v3587_v18  ;;  %v472_v53 = vld [vmem:[%s4881_s2 + $0xd8] sm:$0xff]  ;;  %v469_v54 = vld [vmem:[%s4881_s2 + $0xc0] sm:$0xff]  ;;  %v471_v55 = vld [vmem:[%s4881_s2 + $0xd0] sm:$0xff] }
  0x29   : > { %v450_v56 = vld [vmem:[%s4881_s2 + $0x28] sm:$0xff]  ;;  %v452_v58 = vld [vmem:[%s4881_s2 + $0x38] sm:$0xff]  ;;  %v449_v0 = vld [vmem:[%s4881_s2 + $0x20] sm:$0xff] }
  0x2a   : > { %3558 = vmatpush3.bf16.msra.mxu0 %v3557_v24  ;;  %v462_v57 = vld [vmem:[%s4881_s2 + $0x88] sm:$0xff]  ;;  %v464_v61 = vld [vmem:[%s4881_s2 + $0x98] sm:$0xff]  ;;  %v461_v3 = vld [vmem:[%s4881_s2 + $0x80] sm:$0xff] }
  0x2b   : > { %3590 = vmatpush3.bf16.msra.mxu1 %v3589_v25  ;;  %3560 = vmatprep.subr.bf16.mxu0 %v3559_v26  ;;  %v3603_v60 = vpack.c.bf16 %v462_v57, %v450_v56  ;;  %v3607_v62 = vpack.c.bf16 %v464_v61, %v452_v58  ;;  %v451_v4 = vld [vmem:[%s4881_s2 + $0x30] sm:$0xff]  ;;  %v3605_v10 = vpack.c.bf16 %v461_v3, %v449_v0  ;;  %v474_v17 = vld [vmem:[%s4881_s2 + $0xe8] sm:$0xff]  ;;  %v476_v18 = vld [vmem:[%s4881_s2 + $0xf8] sm:$0xff] }
  0x2c   : > { %3592 = vmatprep.subr.bf16.mxu1 %v3591_v30  ;;  %v463_v5 = vld [vmem:[%s4881_s2 + $0x90] sm:$0xff]  ;;  %v454_v19 = vld [vmem:[%s4881_s2 + $0x48] sm:$0xff]  ;;  %v456_v22 = vld [vmem:[%s4881_s2 + $0x58] sm:$0xff] }
  0x2d   : > { %v3609_v11 = vpack.c.bf16 %v463_v5, %v451_v4  ;;  %v466_v21 = vld [vmem:[%s4881_s2 + $0xa8] sm:$0xff]  ;;  %v468_v23 = vld [vmem:[%s4881_s2 + $0xb8] sm:$0xff]  ;;  %v473_v25 = vld [vmem:[%s4881_s2 + $0xe0] sm:$0xff] }
  0x2e   : > { %3562 = vmatpush3.bf16.msra.mxu0 %v3561_v36  ;;  %v475_v26 = vld [vmem:[%s4881_s2 + $0xf0] sm:$0xff]  ;;  %v453_v27 = vld [vmem:[%s4881_s2 + $0x40] sm:$0xff]  ;;  %v3611_v28 = vpack.c.bf16 %v466_v21, %v454_v19  ;;  %v3615_v29 = vpack.c.bf16 %v468_v23, %v456_v22  ;;  %v478_v35 = vld [vmem:[%s4881_s2 + $0x108] sm:$0xff] }
  0x2f   : > { %3594 = vmatpush3.bf16.msra.mxu1 %v3593_v37  ;;  %3596 = vmatprep.subr.bf16.mxu0 %v3595_v38  ;;  %v465_v30 = vld [vmem:[%s4881_s2 + $0xa0] sm:$0xff]  ;;  %v455_v31 = vld [vmem:[%s4881_s2 + $0x50] sm:$0xff]  ;;  %v480_v36 = vld [vmem:[%s4881_s2 + $0x118] sm:$0xff] }
  0x30   : > { %3600 = vmatprep.subr.bf16.mxu1 %v3599_v39  ;;  %v467_v32 = vld [vmem:[%s4881_s2 + $0xb0] sm:$0xff]  ;;  %v3613_v33 = vpack.c.bf16 %v465_v30, %v453_v27  ;;  %v477_v37 = vld [vmem:[%s4881_s2 + $0x100] sm:$0xff]  ;;  %v3864_v39 = vmov 1983009808  }
  0x31   : > { %360 = vmatmul.mubr.f32.vlgmr.msra.gmra.mrb[0].mxu0 %v223_v44  ;;  %v3617_v34 = vpack.c.bf16 %v467_v32, %v455_v31  ;;  %v479_v38 = vld [vmem:[%s4881_s2 + $0x110] sm:$0xff]  ;;  %v953_v40 = vunpack.c.l.s4 %v3864_v39  ;;  %v3865_v44 = vmov 1934713408  }
  0x32   : > { %435 = vmatmul.mubr.f32.vlgmr.msra.gmra.mrb[0].mxu1 %v225_v45  ;;  %364 = vmatprep.mubr.f32.mxu0 %v228_v46  ;;  %v1017_v45 = vunpack.c.l.s4 %v3865_v44 }
  0x33   : > { %439 = vmatprep.mubr.f32.mxu1 %v230_v48  ;;  %3598 = vmatpush1.bf16.msra.mxu0 %v3597_v47  ;;  %v954_v42 = vunpack.c.0.s8 %v953_v40 }
  0x34   : > { %3602 = vmatpush1.bf16.msra.mxu1 %v3601_v49  ;;  %492 = vmatprep.subr.mxu0 %v470_v52  ;;  %v1018_v49 = vunpack.c.0.s8 %v1017_v45 }
  0x35   : > { %365 = vmatmul.mubr.f32.gmra.mrb[2].mxu0 %v227_v50  ;;  %569 = vmatprep.subr.mxu1 %v472_v53  ;;  %v4291_v46 = vsub.s32 %v954_v42, %v956_v43 }
  0x36   : > { %440 = vmatmul.mubr.f32.gmra.mrb[2].mxu1 %v229_v51  ;;  %552 = vmatprep.mubr.f32.mxu0 %v3863_v59  ;;  %v4297_v61 = vsub.s32 %v1018_v49, %v956_v43 }
  0x37   : > { %493 = vmatpush1.msra.mxu0 %v469_v54  ;;  %629 = vmatprep.mubr.f32.mxu1 %v3863_v59 }
  0x38   : > { %570 = vmatpush1.msra.mxu1 %v471_v55  ;;  %3604 = vmatprep.subr.bf16.mxu0 %v3603_v60 }
  0x39   : > { %3608 = vmatprep.subr.bf16.mxu1 %v3607_v62 }
 0x104   : > { %v3323_v63 = vpop.f32.mrb[0].mxu0 }
 0x105   : > { %v3361_v1 = vpop.f32.mrb[0].mxu1  ;;  %v3324_v2 = vpop.f32.mrb[1].mxu0 }
 0x106   : > { %v3325_v6 = vadd.f32 %v3324_v2, %v3323_v63  ;;  %v3362_v7 = vpop.f32.mrb[1].mxu1 }
 0x107   : > { %v3363_v8 = vadd.f32 %v3362_v7, %v3361_v1 }
 0x108   : > { %v3326_v9 = vpop.f32.mrb[2].mxu0 }
 0x109   : > { %v437_v12 = vadd.f32 %v3363_v8, %v3325_v6  ;;  %v3364_v13 = vpop.f32.mrb[2].mxu1  ;;  %v3327_v14 = vpop.f32.mrb[3].mxu0 }
 0x10a   : > { %v3328_v15 = vadd.f32 %v3327_v14, %v3326_v9  ;;  %v3365_v16 = vpop.f32.mrb[3].mxu1 }
 0x10b   : > { %v3366_v20 = vadd.f32 %v3365_v16, %v3364_v13  ;;  %3236 = vmatmul.mubr.msk.f32.vlgmr.msra.gmra.mrb[4].mxu0 %vm481_vm0, %v437_v12  ;;  %3238 = vmatmul.mubr.msk.f32.vlgmr.msra.gmra.mrb[4].mxu1 %vm481_vm0, %v437_v12 }
 0x10c   : > { %3606 = vmatpush1.bf16.msra.mxu0 %v3605_v10  ;;  %3610 = vmatpush1.bf16.msra.mxu1 %v3609_v11 }
 0x10d   : > { %v442_v24 = vadd.f32 %v3366_v20, %v3328_v15  ;;  %558 = vmatprep.mubr.f32.mxu0 %v3863_v59  ;;  %635 = vmatprep.mubr.f32.mxu1 %v3863_v59 }
 0x10e   : > { %646 = vmatprep.subr.mxu0 %v474_v17  ;;  %723 = vmatprep.subr.mxu1 %v476_v18 }
 0x10f   : > { %3237 = vmatmul.mubr.msk.f32.gmra.mrb[6].mxu0 %vm481_vm0, %v442_v24  ;;  %3239 = vmatmul.mubr.msk.f32.gmra.mrb[6].mxu1 %vm481_vm0, %v442_v24 }
 0x110   : > { %647 = vmatpush1.msra.mxu0 %v473_v25  ;;  %724 = vmatpush1.msra.mxu1 %v475_v26 }
 0x111   : > { %706 = vmatprep.mubr.f32.mxu0 %v3863_v59  ;;  %783 = vmatprep.mubr.f32.mxu1 %v3863_v59 }
 0x112   : > { %3612 = vmatprep.subr.bf16.mxu0 %v3611_v28  ;;  %3616 = vmatprep.subr.bf16.mxu1 %v3615_v29 }
 0x113   : > { %3240 = vmatmul.mubr.msk.f32.vlgmr.msra.gmra.mrb[8].mxu0 %vm481_vm0, %v437_v12  ;;  %3242 = vmatmul.mubr.msk.f32.vlgmr.msra.gmra.mrb[8].mxu1 %vm481_vm0, %v437_v12 }
 0x114   : > { %712 = vmatprep.mubr.f32.mxu0 %v3863_v59  ;;  %789 = vmatprep.mubr.f32.mxu1 %v3863_v59 }
 0x115   : > { %3614 = vmatpush1.bf16.msra.mxu0 %v3613_v33  ;;  %3618 = vmatpush1.bf16.msra.mxu1 %v3617_v34 }
 0x116   : > { %800 = vmatprep.subr.mxu0 %v478_v35  ;;  %877 = vmatprep.subr.mxu1 %v480_v36 }
 0x117   : > { %3241 = vmatmul.mubr.msk.f32.gmra.mrb[10].mxu0 %vm481_vm0, %v442_v24  ;;  %3243 = vmatmul.mubr.msk.f32.gmra.mrb[10].mxu1 %vm481_vm0, %v442_v24 }
 0x118   : > { %860 = vmatprep.mubr.f32.mxu0 %v3863_v59  ;;  %937 = vmatprep.mubr.f32.mxu1 %v3863_v59 }
 0x119   : > { %801 = vmatpush1.msra.mxu0 %v477_v37  ;;  %878 = vmatpush1.msra.mxu1 %v479_v38 }
 0x11b   : > { %3244 = vmatmul.mubr.msk.f32.vlgmr.msra.gmra.mrb[12].mxu0 %vm481_vm0, %v437_v12  ;;  %3246 = vmatmul.mubr.msk.f32.vlgmr.msra.gmra.mrb[12].mxu1 %vm481_vm0, %v437_v12 }
 0x11c   : > { %866 = vmatprep.mubr.f32.mxu0 %v3863_v59  ;;  %943 = vmatprep.mubr.f32.mxu1 %v3863_v59 }
 0x11f   : > { %3245 = vmatmul.mubr.msk.f32.gmra.mrb[14].mxu0 %vm481_vm0, %v442_v24  ;;  %3247 = vmatmul.mubr.msk.f32.gmra.mrb[14].mxu1 %vm481_vm0, %v442_v24 }
 0x1de   : > { %v554_v47 = vpop.f32.mrb[4].mxu0  ;;  %v631_v48 = vpop.f32.mrb[4].mxu1 }
 0x1df   : > { %v950_v50 = vcombine.low %v554_v47, %v631_v48  ;;  %v951_v51 = vcombine.high %v554_v47, %v631_v48  ;;  %v556_v52 = vpop.f32.mrb[5].mxu0  ;;  %v633_v53 = vpop.f32.mrb[5].mxu1 }
 0x1e0   : > { %v966_v54 = vcombine.low %v556_v52, %v633_v53  ;;  %v967_v55 = vcombine.high %v556_v52, %v633_v53 }
 0x1e1   : > { %v958_v56 = vrot.slane %v950_v50, %v4291_v46  ;;  %v965_v57 = vrot.slane %v951_v51, %v4291_v46 }
 0x1e2   : > { %v974_v58 = vrot.slane %v966_v54, %v4291_v46  ;;  %v981_v60 = vrot.slane %v967_v55, %v4291_v46  ;;  %v560_v62 = vpop.f32.mrb[6].mxu0  ;;  %v637_v63 = vpop.f32.mrb[6].mxu1 }
 0x1e3   : > { %v1154_v0 = vcombine.low %v560_v62, %v637_v63  ;;  %v1155_v1 = vcombine.high %v560_v62, %v637_v63  ;;  %v562_v2 = vpop.f32.mrb[7].mxu0  ;;  %v639_v3 = vpop.f32.mrb[7].mxu1 }
 0x1e4   : > { %v1014_v4 = vcombine.low %v958_v56, %v974_v58  ;;  %v1015_v5 = vcombine.high %v958_v56, %v974_v58  ;;  %v1030_v6 = vcombine.low %v965_v57, %v981_v60  ;;  %v1031_v7 = vcombine.high %v965_v57, %v981_v60 }
 0x1e5   : > { %v1162_v8 = vrot.slane %v1154_v0, %v4291_v46  ;;  %v1169_v9 = vrot.slane %v1155_v1, %v4291_v46  ;;  %v1170_v10 = vcombine.low %v562_v2, %v639_v3  ;;  %v1171_v11 = vcombine.high %v562_v2, %v639_v3 }
 0x1e6   : > { %v4302_v12 = vrot.slane %v1014_v4, %v4297_v61  ;;  %v4305_v13 = vrot.slane %v1015_v5, %v4297_v61  ;;  %v4308_v14 = vrot.slane %v1030_v6, %v4297_v61  ;;  %v4311_v15 = vrot.slane %v1031_v7, %v4297_v61  ;;  %v708_v16 = vpop.f32.mrb[8].mxu0  ;;  %v785_v17 = vpop.f32.mrb[8].mxu1 }
 0x1e7   : > { %v1178_v18 = vrot.slane %v1170_v10, %v4291_v46  ;;  %v1185_v19 = vrot.slane %v1171_v11, %v4291_v46  ;;  %v982_v20 = vcombine.low %v708_v16, %v785_v17  ;;  %v983_v21 = vcombine.high %v708_v16, %v785_v17  ;;  %v710_v22 = vpop.f32.mrb[9].mxu0  ;;  %v787_v23 = vpop.f32.mrb[9].mxu1 }
 0x1e8   : > { %v3248_v24 = vcombine.low %v4302_v12, %v4305_v13  ;;  %v3250_v25 = vcombine.high %v4302_v12, %v4305_v13  ;;  %v3252_v26 = vcombine.low %v4308_v14, %v4311_v15  ;;  %v3254_v27 = vcombine.high %v4308_v14, %v4311_v15 }
 0x1e9   : > { %v1218_v28 = vcombine.low %v1162_v8, %v1178_v18  ;;  %v1219_v29 = vcombine.high %v1162_v8, %v1178_v18  ;;  %v1234_v30 = vcombine.low %v1169_v9, %v1185_v19  ;;  %v1235_v31 = vcombine.high %v1169_v9, %v1185_v19 }
 0x1ea   : > { %v990_v32 = vrot.slane %v982_v20, %v4291_v46  ;;  %v997_v33 = vrot.slane %v983_v21, %v4291_v46  ;;  %v998_v34 = vcombine.low %v710_v22, %v787_v23  ;;  %v999_v35 = vcombine.high %v710_v22, %v787_v23  ;;  %v714_v36 = vpop.f32.mrb[10].mxu0  ;;  %v791_v37 = vpop.f32.mrb[10].mxu1 }
 0x1eb   : > { %v1226_v38 = vrot.slane %v1218_v28, %v4297_v61  ;;  %v1233_v39 = vrot.slane %v1219_v29, %v4297_v61  ;;  %v1242_v40 = vrot.slane %v1234_v30, %v4297_v61  ;;  %v1249_v41 = vrot.slane %v1235_v31, %v4297_v61  ;;  %v716_v42 = vpop.f32.mrb[11].mxu0  ;;  %v793_v43 = vpop.f32.mrb[11].mxu1 }
 0x1ec   : > { %v1006_v44 = vrot.slane %v998_v34, %v4291_v46  ;;  %v1013_v45 = vrot.slane %v999_v35, %v4291_v46  ;;  %v1186_v47 = vcombine.low %v714_v36, %v791_v37  ;;  %v1187_v48 = vcombine.high %v714_v36, %v791_v37 }
 0x1ed   : > { %v3256_v49 = vcombine.low %v1226_v38, %v1233_v39  ;;  %v3258_v50 = vcombine.high %v1226_v38, %v1233_v39  ;;  %v3260_v51 = vcombine.low %v1242_v40, %v1249_v41  ;;  %v3262_v52 = vcombine.high %v1242_v40, %v1249_v41 }
 0x1ee   : > { %v1046_v53 = vcombine.low %v990_v32, %v1006_v44  ;;  %v1047_v54 = vcombine.high %v990_v32, %v1006_v44  ;;  %v1062_v55 = vcombine.low %v997_v33, %v1013_v45  ;;  %v1063_v56 = vcombine.high %v997_v33, %v1013_v45  ;;  %v862_v57 = vpop.f32.mrb[12].mxu0  ;;  %v939_v58 = vpop.f32.mrb[12].mxu1 }
 0x1ef   : > { %v4332_v60 = vrot.slane %v3256_v49, %v4291_v46  ;;  %v4335_v62 = vrot.slane %v3258_v50, %v4291_v46  ;;  %v4338_v63 = vrot.slane %v3260_v51, %v4291_v46  ;;  %v4341_v0 = vrot.slane %v3262_v52, %v4291_v46  ;;  %v864_v1 = vpop.f32.mrb[13].mxu0  ;;  %v941_v2 = vpop.f32.mrb[13].mxu1 }
 0x1f0   : > { %v1054_v3 = vrot.slane %v1046_v53, %v4297_v61  ;;  %v1061_v4 = vrot.slane %v1047_v54, %v4297_v61  ;;  %v1070_v5 = vrot.slane %v1062_v55, %v4297_v61  ;;  %v1077_v6 = vrot.slane %v1063_v56, %v4297_v61 }
 0x1f1   : > { %v1558_v7 = vcombine.low %v4332_v60, %v4335_v62  ;;  %v1590_v8 = vcombine.low %v4338_v63, %v4341_v0  ;;  %v1194_v9 = vrot.slane %v1186_v47, %v4291_v46  ;;  %v1201_v10 = vrot.slane %v1187_v48, %v4291_v46 }
 0x1f2   : > { %v3249_v11 = vcombine.low %v1054_v3, %v1061_v4  ;;  %v3251_v16 = vcombine.high %v1054_v3, %v1061_v4  ;;  %v3253_v17 = vcombine.low %v1070_v5, %v1077_v6  ;;  %v3255_v18 = vcombine.high %v1070_v5, %v1077_v6  ;;  %v868_v19 = vpop.f32.mrb[14].mxu0  ;;  %v945_v20 = vpop.f32.mrb[14].mxu1 }
 0x1f3   : > { %v1202_v21 = vcombine.low %v716_v42, %v793_v43  ;;  %v1203_v22 = vcombine.high %v716_v42, %v793_v43  ;;  %v1086_v23 = vcombine.low %v862_v57, %v939_v58  ;;  %v1087_v28 = vcombine.high %v862_v57, %v939_v58  ;;  %v4353_v29 = vpop.f32.mrb[15].mxu0  ;;  %v4355_v30 = vpop.f32.mrb[15].mxu1 }
 0x1f4   : > { %v4358_v31 = vrot.slane %v3249_v11, %v4291_v46  ;;  %v4361_v32 = vrot.slane %v3251_v16, %v4291_v46  ;;  %v4364_v33 = vrot.slane %v3253_v17, %v4291_v46  ;;  %v4367_v34 = vrot.slane %v3255_v18, %v4291_v46 }
 0x1f5   : > { %v1210_v35 = vrot.slane %v1202_v21, %v4291_v46  ;;  %v1217_v36 = vrot.slane %v1203_v22, %v4291_v46  ;;  %v1094_v37 = vrot.slane %v1086_v23, %v4291_v46  ;;  %v1101_v38 = vrot.slane %v1087_v28, %v4291_v46 }
 0x1f6   : > { %v1102_v39 = vcombine.low %v864_v1, %v941_v2  ;;  %v1103_v40 = vcombine.high %v864_v1, %v941_v2  ;;  %v1290_v41 = vcombine.low %v868_v19, %v945_v20  ;;  %v1291_v42 = vcombine.high %v868_v19, %v945_v20 }
 0x1f7   : > { %v1250_v43 = vcombine.low %v1194_v9, %v1210_v35  ;;  %v1251_v44 = vcombine.high %v1194_v9, %v1210_v35  ;;  %v1266_v45 = vcombine.low %v1201_v10, %v1217_v36  ;;  %v1267_v47 = vcombine.high %v1201_v10, %v1217_v36 }
 0x1f8   : > { %v1110_v48 = vrot.slane %v1102_v39, %v4291_v46  ;;  %v1117_v49 = vrot.slane %v1103_v40, %v4291_v46  ;;  %v1298_v50 = vrot.slane %v1290_v41, %v4291_v46  ;;  %v4377_v51 = vrot.slane %v1291_v42, %v4291_v46 }
 0x1f9   : > { %v1258_v52 = vrot.slane %v1250_v43, %v4297_v61  ;;  %v1265_v53 = vrot.slane %v1251_v44, %v4297_v61  ;;  %v1274_v54 = vrot.slane %v1266_v45, %v4297_v61  ;;  %v1281_v55 = vrot.slane %v1267_v47, %v4297_v61 }
 0x1fa   : > { %v1118_v56 = vcombine.low %v1094_v37, %v1110_v48  ;;  %v1119_v57 = vcombine.high %v1094_v37, %v1110_v48  ;;  %v1134_v58 = vcombine.low %v1101_v38, %v1117_v49  ;;  %v1135_v1 = vcombine.high %v1101_v38, %v1117_v49 }
 0x1fb   : > { %v3257_v2 = vcombine.low %v1258_v52, %v1265_v53  ;;  %v3259_v3 = vcombine.high %v1258_v52, %v1265_v53  ;;  %v3261_v4 = vcombine.low %v1274_v54, %v1281_v55  ;;  %v3263_v5 = vcombine.high %v1274_v54, %v1281_v55 }
 0x1fc   : > { %v1126_v6 = vrot.slane %v1118_v56, %v4297_v61  ;;  %v1133_v9 = vrot.slane %v1119_v57, %v4297_v61  ;;  %v1142_v10 = vrot.slane %v1134_v58, %v4297_v61  ;;  %v1149_v11 = vrot.slane %v1135_v1, %v4297_v61 }
 0x1fd   : > { %v4388_v16 = vrot.slane %v3257_v2, %v4291_v46  ;;  %v4391_v17 = vrot.slane %v3259_v3, %v4291_v46  ;;  %v4394_v18 = vrot.slane %v3261_v4, %v4291_v46  ;;  %v4397_v19 = vrot.slane %v3263_v5, %v4291_v46 }
 0x1fe   : > { %v1630_v20 = vcombine.low %v1126_v6, %v1133_v9  ;;  %v3264_v21 = vcombine.high %v1126_v6, %v1133_v9  ;;  %v1646_v22 = vcombine.low %v1142_v10, %v1149_v11  ;;  %v3265_v23 = vcombine.high %v1142_v10, %v1149_v11 }
 0x1ff   : > { %v4403_v28 = vrot.slane %v3248_v24, %v4291_v46  ;;  %v4409_v35 = vrot.slane %v3250_v25, %v4291_v46  ;;  %v4415_v36 = vrot.slane %v3252_v26, %v4291_v46  ;;  %v4421_v37 = vrot.slane %v3254_v27, %v4291_v46 }
 0x200   : > { %v4424_v24 = vrot.slane %v1630_v20, %v4291_v46  ;;  %v4427_v38 = vrot.slane %v3264_v21, %v4291_v46  ;;  %v4430_v12 = vrot.slane %v1646_v22, %v4291_v46  ;;  %v4433_v13 = vrot.slane %v3265_v23, %v4291_v46 }
 0x201   : > { %v1422_v25 = vcombine.low %v4403_v28, %v4409_v35  ;;  %v1454_v14 = vcombine.low %v4415_v36, %v4421_v37  ;;  %v1306_v15 = vcombine.low %v4353_v29, %v4355_v30  ;;  %v1307_v26 = vcombine.high %v4353_v29, %v4355_v30 }
 0x202   : > { %v1438_v27 = vcombine.low %v4358_v31, %v4361_v32  ;;  %v1470_v39 = vcombine.low %v4364_v33, %v4367_v34  ;;  %v1574_v40 = vcombine.low %v4388_v16, %v4391_v17  ;;  %v1606_v41 = vcombine.low %v4394_v18, %v4397_v19 }
 0x203   : > { %v1430_v42 = vrot.slane %v1422_v25, %v4297_v61  ;;  %v1462_v43 = vrot.slane %v1454_v14, %v4297_v61  ;;  %v1314_v44 = vrot.slane %v1306_v15, %v4291_v46  ;;  %v1321_v29 = vrot.slane %v1307_v26, %v4291_v46 }
 0x204   : > { %v1446_v30 = vrot.slane %v1438_v27, %v4297_v61  ;;  %v1478_v45 = vrot.slane %v1470_v39, %v4297_v61  ;;  %v1582_v47 = vrot.slane %v1574_v40, %v4297_v61  ;;  %v1614_v48 = vrot.slane %v1606_v41, %v4297_v61 }
 0x205   : > { %v1486_v49 = vcombine.low %v1430_v42, %v1462_v43  ;;  %v1487_v52 = vcombine.high %v1430_v42, %v1462_v43  ;;  %v1322_v53 = vcombine.low %v1298_v50, %v1314_v44  ;;  %v1323_v54 = vcombine.high %v1298_v50, %v1314_v44 }
 0x206   : > { %v1338_v55 = vcombine.low %v4377_v51, %v1321_v29  ;;  %v1339_v56 = vcombine.high %v4377_v51, %v1321_v29  ;;  %v1490_v57 = vcombine.low %v1446_v30, %v1478_v45  ;;  %v1626_v58 = vcombine.low %v1582_v47, %v1614_v48 }
 0x207   : > { %3479 = vmatprep.mubr.f32.mxu0 %v1486_v49  ;;  %3486 = vmatprep.mubr.f32.mxu1 %v1487_v52  ;;  %v1330_v1 = vrot.slane %v1322_v53, %v4297_v61  ;;  %v1337_v2 = vrot.slane %v1323_v54, %v4297_v61  ;;  %v1491_v3 = vcombine.high %v1446_v30, %v1478_v45 }
 0x208   : > { %v1346_v4 = vrot.slane %v1338_v55, %v4297_v61  ;;  %v1353_v5 = vrot.slane %v1339_v56, %v4297_v61  ;;  %v3619_v6 = vpack.c.bf16 %v1626_v58, %v1490_v57  ;;  %v1627_v9 = vcombine.high %v1582_v47, %v1614_v48 }
 0x209   : > { %v1698_v50 = vcombine.low %v1330_v1, %v1337_v2  ;;  %v3266_v10 = vcombine.high %v1330_v1, %v1337_v2  ;;  %v1439_v51 = vcombine.high %v4358_v31, %v4361_v32  ;;  %v1471_v11 = vcombine.high %v4364_v33, %v4367_v34 }
 0x20a   : > { %v1714_v20 = vcombine.low %v1346_v4, %v1353_v5  ;;  %v3267_v21 = vcombine.high %v1346_v4, %v1353_v5  ;;  %3620 = vmatprep.subr.bf16.mxu0 %v3619_v6  ;;  %v3623_v22 = vpack.c.bf16 %v1627_v9, %v1491_v3  ;;  %v1575_v23 = vcombine.high %v4388_v16, %v4391_v17 }
 0x20b   : > { %v4472_v25 = vrot.slane %v1698_v50, %v4291_v46  ;;  %v4475_v14 = vrot.slane %v3266_v10, %v4291_v46  ;;  %3622 = vmatpush3.bf16.xpose.msra.mxu0 %v3619_v6  ;;  %v1453_v15 = vrot.slane %v1439_v51, %v4297_v61  ;;  %v1485_v31 = vrot.slane %v1471_v11, %v4297_v61 }
 0x20c   : > { %v4480_v32 = vrot.slane %v1714_v20, %v4291_v46  ;;  %v1729_v33 = vrot.slane %v3267_v21, %v4291_v46  ;;  %3624 = vmatprep.subr.bf16.mxu1 %v3623_v22  ;;  %v1589_v34 = vrot.slane %v1575_v23, %v4297_v61  ;;  %v1607_v16 = vcombine.high %v4394_v18, %v4397_v19 }
 0x20d   : > { %3626 = vmatpush3.bf16.xpose.msra.mxu1 %v3623_v22  ;;  %v1492_v17 = vcombine.low %v1453_v15, %v1485_v31  ;;  %v1493_v26 = vcombine.high %v1453_v15, %v1485_v31  ;;  %v1566_v27 = vrot.slane %v1558_v7, %v4297_v61  ;;  %v1598_v39 = vrot.slane %v1590_v8, %v4297_v61 }
 0x20e   : > { %v1621_v40 = vrot.slane %v1607_v16, %v4297_v61  ;;  %v1423_v41 = vcombine.high %v4403_v28, %v4409_v35  ;;  %v1455_v18 = vcombine.high %v4415_v36, %v4421_v37  ;;  %v1662_v19 = vcombine.low %v4424_v24, %v4427_v38 }
 0x20f   : > { %v1622_v42 = vcombine.low %v1566_v27, %v1598_v39  ;;  %v1623_v43 = vcombine.high %v1566_v27, %v1598_v39  ;;  %v1678_v7 = vcombine.low %v4430_v12, %v4433_v13  ;;  %v1730_v44 = vcombine.low %v4472_v25, %v4475_v14 }
 0x210   : > { %v1628_v8 = vcombine.low %v1589_v34, %v1621_v40  ;;  %v1629_v29 = vcombine.high %v1589_v34, %v1621_v40  ;;  %v1437_v30 = vrot.slane %v1423_v41, %v4297_v61  ;;  %v1469_v28 = vrot.slane %v1455_v18, %v4297_v61 }
 0x211   : > { %v1670_v35 = vrot.slane %v1662_v19, %v4297_v61  ;;  %v1686_v36 = vrot.slane %v1678_v7, %v4297_v61  ;;  %v1738_v37 = vrot.slane %v1730_v44, %v4297_v61  ;;  %v1746_v45 = vcombine.low %v4480_v32, %v1729_v33 }
 0x212   : > { %v3627_v47 = vpack.c.bf16 %v1628_v8, %v1492_v17  ;;  %v3631_v48 = vpack.c.bf16 %v1629_v29, %v1493_v26  ;;  %3480 = vmatmul.mubr.f32.vlgmr.msra.gmra.mrb[16].mxu0 %v1622_v42  ;;  %v1488_v49 = vcombine.low %v1437_v30, %v1469_v28  ;;  %v1489_v52 = vcombine.high %v1437_v30, %v1469_v28 }
 0x213   : > { %v1694_v53 = vcombine.low %v1670_v35, %v1686_v36  ;;  %v1754_v54 = vrot.slane %v1746_v45, %v4297_v61  ;;  %v1695_v55 = vcombine.high %v1670_v35, %v1686_v36  ;;  %v1559_v56 = vcombine.high %v4332_v60, %v4335_v62 }
 0x214   : > { %3628 = vmatprep.subr.bf16.mxu0 %v3627_v47  ;;  %3632 = vmatprep.subr.bf16.mxu1 %v3631_v48  ;;  %v1591_v57 = vcombine.high %v4338_v63, %v4341_v0  ;;  %v1663_v58 = vcombine.high %v4424_v24, %v4427_v38  ;;  %v1679_v1 = vcombine.high %v4430_v12, %v4433_v13 }
 0x215   : > { %3487 = vmatmul.mubr.f32.vlgmr.msra.gmra.mrb[16].mxu1 %v1623_v43  ;;  %3630 = vmatpush3.bf16.xpose.msra.mxu0 %v3627_v47  ;;  %v1762_v2 = vcombine.low %v1738_v37, %v1754_v54  ;;  %v1763_v3 = vcombine.high %v1738_v37, %v1754_v54  ;;  %v1573_v4 = vrot.slane %v1559_v56, %v4297_v61 }
 0x216   : > { %3493 = vmatprep.mubr.f32.mxu0 %v1488_v49  ;;  %3634 = vmatpush3.bf16.xpose.msra.mxu1 %v3631_v48  ;;  %v1605_v60 = vrot.slane %v1591_v57, %v4297_v61  ;;  %v1677_v62 = vrot.slane %v1663_v58, %v4297_v61  ;;  %v1693_v63 = vrot.slane %v1679_v1, %v4297_v61 }
 0x217   : > { %3500 = vmatprep.mubr.f32.mxu1 %v1489_v52  ;;  %v3635_v0 = vpack.c.bf16 %v1762_v2, %v1694_v53  ;;  %v3639_v24 = vpack.c.bf16 %v1763_v3, %v1695_v55  ;;  %v1731_v38 = vcombine.high %v4472_v25, %v4475_v14  ;;  %v1747_v12 = vcombine.high %v4480_v32, %v1729_v33 }
 0x218   : > { %v1624_v13 = vcombine.low %v1573_v4, %v1605_v60  ;;  %v1625_v5 = vcombine.high %v1573_v4, %v1605_v60  ;;  %v1696_v6 = vcombine.low %v1677_v62, %v1693_v63  ;;  %v1697_v9 = vcombine.high %v1677_v62, %v1693_v63 }
 0x219   : > { %3636 = vmatprep.subr.bf16.mxu0 %v3635_v0  ;;  %3640 = vmatprep.subr.bf16.mxu1 %v3639_v24  ;;  %v1745_v50 = vrot.slane %v1731_v38, %v4297_v61  ;;  %v1761_v10 = vrot.slane %v1747_v12, %v4297_v61 }
 0x21b   : > { %v1764_v51 = vcombine.low %v1745_v50, %v1761_v10  ;;  %v1765_v11 = vcombine.high %v1745_v50, %v1761_v10 }
 0x21c   : > { %3494 = vmatmul.mubr.f32.vlgmr.msra.gmra.mrb[18].mxu0 %v1624_v13 }
 0x21d   : > { %3501 = vmatmul.mubr.f32.vlgmr.msra.gmra.mrb[18].mxu1 %v1625_v5  ;;  %3638 = vmatpush3.bf16.msra.mxu0 %v3635_v0  ;;  %v4529_v20 = vpack.c.bf16 %v1764_v51, %v1696_v6  ;;  %v4531_v21 = vpack.c.bf16 %v1765_v11, %v1697_v9 }
 0x21e   : > { %3642 = vmatpush3.bf16.msra.mxu1 %v3639_v24 }
 0x21f   : > { %3644 = vmatprep.subr.bf16.mxu0 %v4529_v20  ;;  %3648 = vmatprep.subr.bf16.mxu1 %v4531_v21 }
 0x2e5   : > { %v3481_v22 = vpop.f32.mrb[16].mxu0 }
 0x2e6   : > { %v2067_v23 = vmul.f32 0.088388346, %v3481_v22  ;;  %v1832_v25 = vpop.f32.mrb[17].mxu0 }
 0x2e7   : > { %v2066_v14 = vmul.f32 0.088388346, %v1832_v25 }
 0x2e8   : > { %v3488_v15 = vpop.f32.mrb[16].mxu1  ;;  %v2078_v31 = vsel %vm2074_vm1, %v2067_v23, -inf }
 0x2e9   : > { %v2069_v32 = vmul.f32 0.088388346, %v3488_v15  ;;  %v1907_v33 = vpop.f32.mrb[17].mxu1  ;;  %2079 = vmax.xlane.f32.xlu1 %v2078_v31  ;;  %v2075_v34 = vsel %vm2074_vm1, %v2066_v14, -inf }
 0x2ea   : > { %v2068_v16 = vmul.f32 0.088388346, %v1907_v33  ;;  %2076 = vmax.xlane.f32.xlu0 %v2075_v34 }
 0x2eb   : > { %v2084_v17 = vsel %vm2074_vm1, %v2069_v32, -inf }
 0x2ec   : > { %v2081_v26 = vsel %vm2074_vm1, %v2068_v16, -inf }
 0x2ed   : > { %2085 = vmax.xlane.f32.xlu1 %v2084_v17 }
 0x2ee   : > { %2082 = vmax.xlane.f32.xlu0 %v2081_v26 }
 0x2ef   : > { %v3495_v27 = vpop.f32.mrb[18].mxu0 }
 0x2f0   : > { %v3502_v39 = vpop.f32.mrb[18].mxu1  ;;  %v1982_v40 = vpop.f32.mrb[19].mxu0  ;;  %v2071_v42 = vmul.f32 0.088388346, %v3495_v27 }
 0x2f1   : > { %v2057_v41 = vpop.f32.mrb[19].mxu1  ;;  %v2070_v18 = vmul.f32 0.088388346, %v1982_v40  ;;  %v2073_v7 = vmul.f32 0.088388346, %v3502_v39 }
 0x2f2   : > { %v2072_v19 = vmul.f32 0.088388346, %v2057_v41  ;;  %v2090_v8 = vsel %vm2074_vm1, %v2071_v42, -inf }
 0x2f3   : > { %v2087_v43 = vsel %vm2074_vm1, %v2070_v18, -inf  ;;  %v2096_v29 = vsel %vm2074_vm1, %v2073_v7, -inf }
 0x2f4   : > { %v2093_v44 = vsel %vm2074_vm1, %v2072_v19, -inf  ;;  %2088 = vmax.xlane.f32.xlu0 %v2087_v43 }
 0x2f5   : > { %2094 = vmax.xlane.f32.xlu1 %v2093_v44 }
 0x2f8   : > { %2091 = vmax.xlane.f32.xlu0 %v2090_v8 }
 0x2f9   : > { %2097 = vmax.xlane.f32.xlu1 %v2096_v29 }
 0x376   : > { %v2080_v30 = vpop.xlane.xlu1 %2079 }
 0x377   : > { %v2100_v28 = vsub.f32 %v2067_v23, %v2080_v30  ;;  %v2077_v35 = vpop.xlane.xlu0 %2076 }
 0x378   : > { %v2099_v36 = vsub.f32 %v2066_v14, %v2077_v35 }
 0x379   : > { %v2109_v37 = vmul.f32 1.442695, %v2100_v28 }
 0x37a   : > { %v2107_v45 = vmul.f32 1.442695, %v2099_v36  ;;  %v2086_v47 = vpop.xlane.xlu1 %2085 }
 0x37b   : > { %3767 = vpow2.f32 %v2109_v37  ;;  %v2102_v48 = vsub.f32 %v2069_v32, %v2086_v47  ;;  %v2083_v49 = vpop.xlane.xlu0 %2082 }
 0x37c   : > { %v2101_v52 = vsub.f32 %v2068_v16, %v2083_v49  ;;  %3769 = vpow2.f32 %v2107_v45  ;;  %v2807_v45 = vld [vmem:[%s4882_s3 + $0x180] sm:$0xff] }
 0x37d   : > { %v2113_v53 = vmul.f32 1.442695, %v2102_v48  ;;  %v2808_v48 = vld [vmem:[%s4882_s3 + $0x188] sm:$0xff]  ;;  %v2759_v49 = vld [vmem:[%s4882_s3] sm:$0xff] }
 0x37e   : > { %v2111_v54 = vmul.f32 1.442695, %v2101_v52  ;;  %v2760_v52 = vld [vmem:[%s4882_s3 + $0x8] sm:$0xff] }
 0x37f   : > { %3771 = vpow2.f32 %v2113_v53  ;;  %v3683_v53 = vpack.c.bf16 %v2808_v48, %v2807_v45  ;;  %v2817_v45 = vld [vmem:[%s4882_s3 + $0x1d0] sm:$0xff] }
 0x380   : > { %3773 = vpow2.f32 %v2111_v54  ;;  %v3653_v54 = vpack.c.bf16 %v2760_v52, %v2759_v49  ;;  %v2769_v48 = vld [vmem:[%s4882_s3 + $0x50] sm:$0xff]  ;;  %v2770_v52 = vld [vmem:[%s4882_s3 + $0x58] sm:$0xff] }
 0x381   : > { %v2089_v55 = vpop.xlane.xlu0 %2088 }
 0x382   : > { %v2095_v56 = vpop.xlane.xlu1 %2094  ;;  %v2103_v57 = vsub.f32 %v2070_v18, %v2089_v55  ;;  %v2791_v55 = vld [vmem:[%s4882_s3 + $0x100] sm:$0xff] }
 0x383   : > { %v2105_v58 = vsub.f32 %v2072_v19, %v2095_v56  ;;  %v2792_v56 = vld [vmem:[%s4882_s3 + $0x108] sm:$0xff] }
 0x384   : > { %v2115_v1 = vmul.f32 1.442695, %v2103_v57  ;;  %v3685_v57 = vpack.c.bf16 %v2792_v56, %v2791_v55  ;;  %v3673_v55 = vpack.c.bf16 %v2770_v52, %v2769_v48  ;;  %v2787_v56 = vld [vmem:[%s4882_s3 + $0xe0] sm:$0xff] }
 0x385   : > { %v3768_v2 = vpop.eup %3767  ;;  %v2119_v3 = vmul.f32 1.442695, %v2105_v58  ;;  %v2092_v4 = vpop.xlane.xlu0 %2091  ;;  %v2777_v58 = vld [vmem:[%s4882_s3 + $0x90] sm:$0xff] }
 0x386   : > { %3775 = vpow2.f32 %v2115_v1  ;;  %v2098_v60 = vpop.xlane.xlu1 %2097  ;;  %v2104_v62 = vsub.f32 %v2071_v42, %v2092_v4  ;;  %v2126_v63 = vsel %vm2074_vm1, %v3768_v2, 0.0  ;;  %v3770_v0 = vpop.eup %3769  ;;  %v2778_v1 = vld [vmem:[%s4882_s3 + $0x98] sm:$0xff] }
 0x387   : > { %3777 = vpow2.f32 %v2119_v3  ;;  %v2106_v24 = vsub.f32 %v2073_v7, %v2098_v60  ;;  %2127 = vadd.xlane.f32.xlu0 %v2126_v63  ;;  %v2123_v6 = vsel %vm2074_vm1, %v3770_v0, 0.0  ;;  %v3655_v3 = vpack.c.bf16 %v2778_v1, %v2777_v58  ;;  %v2810_v4 = vld [vmem:[%s4882_s3 + $0x198] sm:$0xff]  ;;  %v2761_v60 = vld [vmem:[%s4882_s3 + $0x10] sm:$0xff]  ;;  %v2819_v58 = vld [vmem:[%s4882_s3 + $0x1e0] sm:$0xff] }
 0x388   : > { %v2117_v38 = vmul.f32 1.442695, %v2104_v62  ;;  %v2762_v62 = vld [vmem:[%s4882_s3 + $0x18] sm:$0xff] }
 0x389   : > { %v3772_v12 = vpop.eup %3771  ;;  %v2121_v13 = vmul.f32 1.442695, %v2106_v24  ;;  %v2793_v24 = vld [vmem:[%s4882_s3 + $0x110] sm:$0xff] }
 0x38a   : > { %3779 = vpow2.f32 %v2117_v38  ;;  %v2132_v5 = vsel %vm2074_vm1, %v3772_v12, 0.0  ;;  %v3774_v9 = vpop.eup %3773  ;;  %v2794_v38 = vld [vmem:[%s4882_s3 + $0x118] sm:$0xff] }
 0x38b   : > { %3781 = vpow2.f32 %v2121_v13  ;;  %2133 = vadd.xlane.f32.xlu1 %v2132_v5  ;;  %2124 = vadd.xlane.f32.xlu0 %v2123_v6  ;;  %v2129_v50 = vsel %vm2074_vm1, %v3774_v9, 0.0  ;;  %v2779_v13 = vld [vmem:[%s4882_s3 + $0xa0] sm:$0xff]  ;;  %v2780_v5 = vld [vmem:[%s4882_s3 + $0xa8] sm:$0xff] }
 0x38c   : > { %v2811_v6 = vld [vmem:[%s4882_s3 + $0x1a0] sm:$0xff] }
 0x38f   : > { %2130 = vadd.xlane.f32.xlu1 %v2129_v50  ;;  %v2812_v50 = vld [vmem:[%s4882_s3 + $0x1a8] sm:$0xff] }
 0x390   : > { %v3776_v10 = vpop.eup %3775 }
 0x391   : > { %v3778_v51 = vpop.eup %3777  ;;  %v2135_v11 = vsel %vm2074_vm1, %v3776_v10, 0.0 }
 0x392   : > { %2136 = vadd.xlane.f32.xlu0 %v2135_v11  ;;  %v2141_v22 = vsel %vm2074_vm1, %v3778_v51, 0.0  ;;  %v3691_v11 = vpack.c.bf16 %v2812_v50, %v2811_v6  ;;  %v2773_v50 = vld [vmem:[%s4882_s3 + $0x70] sm:$0xff] }
 0x393   : > { %2142 = vadd.xlane.f32.xlu1 %v2141_v22 }
 0x394   : > { %v3780_v23 = vpop.eup %3779 }
 0x395   : > { %v3782_v25 = vpop.eup %3781  ;;  %v2138_v14 = vsel %vm2074_vm1, %v3780_v23, 0.0 }
 0x396   : > { %2139 = vadd.xlane.f32.xlu0 %v2138_v14  ;;  %v2144_v15 = vsel %vm2074_vm1, %v3782_v25, 0.0 }
 0x397   : > { %2145 = vadd.xlane.f32.xlu1 %v2144_v15  ;;  %v2781_v15 = vld [vmem:[%s4882_s3 + $0xb0] sm:$0xff] }
 0x414   : > { %v2128_v31 = vpop.xlane.xlu0 %2127 }
 0x415   : > { %3783 = vrcp.f32 %v2128_v31  ;;  %v2782_v31 = vld [vmem:[%s4882_s3 + $0xb8] sm:$0xff] }
 0x418   : > { %v2134_v32 = vpop.xlane.xlu1 %2133  ;;  %v2125_v33 = vpop.xlane.xlu0 %2124 }
 0x419   : > { %3785 = vrcp.f32 %v2125_v33  ;;  %v3663_v33 = vpack.c.bf16 %v2782_v31, %v2781_v15  ;;  %v2980_v31 = vld [vmem:[%s4883_s4 + $0x38] sm:$0xff] }
 0x41a   : > { %3787 = vrcp.f32 %v2134_v32  ;;  %v2813_v32 = vld [vmem:[%s4882_s3 + $0x1b0] sm:$0xff] }
 0x41c   : > { %v2131_v34 = vpop.xlane.xlu1 %2130 }
 0x41d   : > { %3789 = vrcp.f32 %v2131_v34  ;;  %v2814_v34 = vld [vmem:[%s4882_s3 + $0x1b8] sm:$0xff] }
 0x41f   : > { %v2137_v16 = vpop.xlane.xlu0 %2136  ;;  %v3784_v26 = vpop.eup %3783 }
 0x420   : > { %3791 = vrcp.f32 %v2137_v16  ;;  %v2143_v17 = vpop.xlane.xlu1 %2142  ;;  %v2156_v19 = vmul.f32 %v3784_v26, %v3768_v2  ;;  %v2809_v2 = vld [vmem:[%s4882_s3 + $0x190] sm:$0xff]  ;;  %v3695_v26 = vpack.c.bf16 %v2814_v34, %v2813_v32 }
 0x421   : > { %3793 = vrcp.f32 %v2143_v17  ;;  %v3687_v63 = vpack.c.bf16 %v2810_v4, %v2809_v2  ;;  %v2765_v16 = vld [vmem:[%s4882_s3 + $0x30] sm:$0xff]  ;;  %v2766_v17 = vld [vmem:[%s4882_s3 + $0x38] sm:$0xff]  ;;  %v2771_v4 = vld [vmem:[%s4882_s3 + $0x60] sm:$0xff] }
 0x423   : > { %v2140_v27 = vpop.xlane.xlu0 %2139  ;;  %v3786_v39 = vpop.eup %3785 }
 0x424   : > { %3795 = vrcp.f32 %v2140_v27  ;;  %v2146_v40 = vpop.xlane.xlu1 %2145  ;;  %v2155_v41 = vmul.f32 %v3786_v39, %v3770_v0  ;;  %v3788_v18 = vpop.eup %3787  ;;  %v3657_v0 = vpack.c.bf16 %v2762_v62, %v2761_v60  ;;  %v3665_v27 = vpack.c.bf16 %v2766_v17, %v2765_v16  ;;  %v2797_v39 = vld [vmem:[%s4882_s3 + $0x130] sm:$0xff]  ;;  %v2772_v60 = vld [vmem:[%s4882_s3 + $0x68] sm:$0xff] }
 0x425   : > { %3797 = vrcp.f32 %v2146_v40  ;;  %v2158_v7 = vmul.f32 %v3788_v18, %v3772_v12  ;;  %v3689_v12 = vpack.c.bf16 %v2794_v38, %v2793_v24  ;;  %v2798_v40 = vld [vmem:[%s4882_s3 + $0x138] sm:$0xff]  ;;  %v2789_v24 = vld [vmem:[%s4882_s3 + $0xf0] sm:$0xff] }
 0x426   : > { %3507 = vmatprep.mubr.msk.f32.mxu0 %vm2074_vm1, %v2155_v41  ;;  %v2783_v41 = vld [vmem:[%s4882_s3 + $0xc0] sm:$0xff]  ;;  %v3697_v18 = vpack.c.bf16 %v2798_v40, %v2797_v39  ;;  %v2790_v38 = vld [vmem:[%s4882_s3 + $0xf8] sm:$0xff] }
 0x427   : > { %v3790_v42 = vpop.eup %3789  ;;  %3508 = vmatmul.mubr.msk.f32.vlgmr.msra.gmra.mrb[20].mxu0 %vm2074_vm1, %v2156_v19  ;;  %v2784_v19 = vld [vmem:[%s4882_s3 + $0xc8] sm:$0xff] }
 0x428   : > { %v2157_v43 = vmul.f32 %v3790_v42, %v3774_v9  ;;  %3646 = vmatpush3.bf16.msra.mxu0 %v4529_v20  ;;  %v2775_v20 = vld [vmem:[%s4882_s3 + $0x80] sm:$0xff]  ;;  %v3659_v9 = vpack.c.bf16 %v2780_v5, %v2779_v13  ;;  %v2822_v13 = vld [vmem:[%s4882_s3 + $0x1f8] sm:$0xff]  ;;  %v3677_v5 = vpack.c.bf16 %v2772_v60, %v2771_v4 }
 0x429   : > { %v2815_v42 = vld [vmem:[%s4882_s3 + $0x1c0] sm:$0xff] }
 0x42a   : > { %v3792_v44 = vpop.eup %3791  ;;  %3514 = vmatprep.mubr.msk.f32.mxu1 %vm2074_vm1, %v2157_v43  ;;  %v2816_v43 = vld [vmem:[%s4882_s3 + $0x1c8] sm:$0xff] }
 0x42b   : > { %v3794_v8 = vpop.eup %3793  ;;  %3515 = vmatmul.mubr.msk.f32.vlgmr.msra.gmra.mrb[20].mxu1 %vm2074_vm1, %v2158_v7  ;;  %v2159_v29 = vmul.f32 %v3792_v44, %v3776_v10  ;;  %v2763_v10 = vld [vmem:[%s4882_s3 + $0x20] sm:$0xff]  ;;  %v3667_v7 = vpack.c.bf16 %v2784_v19, %v2783_v41  ;;  %v3699_v44 = vpack.c.bf16 %v2816_v43, %v2815_v42 }
 0x42c   : > { %3650 = vmatpush3.bf16.msra.mxu1 %v4531_v21  ;;  %v2161_v30 = vmul.f32 %v3794_v8, %v3778_v51  ;;  %v2776_v21 = vld [vmem:[%s4882_s3 + $0x88] sm:$0xff]  ;;  %v2767_v8 = vld [vmem:[%s4882_s3 + $0x40] sm:$0xff] }
 0x42d   : > { %3521 = vmatprep.mubr.msk.f32.mxu0 %vm2074_vm1, %v2159_v29  ;;  %v3651_v47 = vpack.c.bf16 %v2776_v21, %v2775_v20  ;;  %3684 = vmatprep.subr.bf16.mxu1 %v3683_v53  ;;  %v2764_v51 = vld [vmem:[%s4882_s3 + $0x28] sm:$0xff]  ;;  %v2801_v53 = vld [vmem:[%s4882_s3 + $0x150] sm:$0xff] }
 0x42e   : > { %v3796_v28 = vpop.eup %3795  ;;  %3528 = vmatprep.mubr.msk.f32.mxu1 %vm2074_vm1, %v2161_v30  ;;  %v3661_v22 = vpack.c.bf16 %v2764_v51, %v2763_v10  ;;  %v2768_v29 = vld [vmem:[%s4882_s3 + $0x48] sm:$0xff]  ;;  %v2799_v30 = vld [vmem:[%s4882_s3 + $0x140] sm:$0xff]  ;;  %v2774_v10 = vld [vmem:[%s4882_s3 + $0x78] sm:$0xff] }
 0x42f   : > { %v3798_v35 = vpop.eup %3797  ;;  %v2160_v36 = vmul.f32 %v3796_v28, %v3780_v23  ;;  %3652 = vmatprep.subr.bf16.mxu0 %v3651_v47  ;;  %v2795_v23 = vld [vmem:[%s4882_s3 + $0x120] sm:$0xff]  ;;  %v3669_v28 = vpack.c.bf16 %v2768_v29, %v2767_v8  ;;  %v2818_v47 = vld [vmem:[%s4882_s3 + $0x1d8] sm:$0xff]  ;;  %v3681_v15 = vpack.c.bf16 %v2774_v10, %v2773_v50 }
 0x430   : > { %v2162_v37 = vmul.f32 %v3798_v35, %v3782_v25  ;;  %v2796_v25 = vld [vmem:[%s4882_s3 + $0x128] sm:$0xff]  ;;  %v3703_v49 = vpack.c.bf16 %v2818_v47, %v2817_v45 }
 0x431   : > { %3522 = vmatmul.mubr.msk.f32.vlgmr.msra.gmra.mrb[22].mxu0 %vm2074_vm1, %v2160_v36  ;;  %v3693_v14 = vpack.c.bf16 %v2796_v25, %v2795_v23  ;;  %v2800_v35 = vld [vmem:[%s4882_s3 + $0x148] sm:$0xff]  ;;  %v2785_v36 = vld [vmem:[%s4882_s3 + $0xd0] sm:$0xff] }
 0x432   : > { %3529 = vmatmul.mubr.msk.f32.vlgmr.msra.gmra.mrb[22].mxu1 %vm2074_vm1, %v2162_v37  ;;  %3654 = vmatpush3.bf16.msra.mxu0 %v3653_v54  ;;  %v2786_v37 = vld [vmem:[%s4882_s3 + $0xd8] sm:$0xff]  ;;  %v3701_v20 = vpack.c.bf16 %v2800_v35, %v2799_v30  ;;  %v2974_v23 = vld [vmem:[%s4883_s4 + $0x8] sm:$0xff] }
 0x433   : > { %3686 = vmatpush3.bf16.msra.mxu1 %v3685_v57  ;;  %3656 = vmatprep.subr.bf16.mxu0 %v3655_v3  ;;  %v3671_v21 = vpack.c.bf16 %v2786_v37, %v2785_v36  ;;  %v2802_v54 = vld [vmem:[%s4882_s3 + $0x158] sm:$0xff]  ;;  %v2788_v57 = vld [vmem:[%s4882_s3 + $0xe8] sm:$0xff] }
 0x434   : > { %3688 = vmatprep.subr.bf16.mxu1 %v3687_v63  ;;  %v3705_v1 = vpack.c.bf16 %v2802_v54, %v2801_v53  ;;  %v3675_v2 = vpack.c.bf16 %v2788_v57, %v2787_v56  ;;  %v2820_v3 = vld [vmem:[%s4882_s3 + $0x1e8] sm:$0xff]  ;;  %v2803_v63 = vld [vmem:[%s4882_s3 + $0x160] sm:$0xff] }
 0x435   : > { %v3707_v62 = vpack.c.bf16 %v2820_v3, %v2819_v58  ;;  %v2978_v25 = vld [vmem:[%s4883_s4 + $0x28] sm:$0xff] }
 0x436   : > { %3658 = vmatpush3.bf16.msra.mxu0 %v3657_v0  ;;  %v2804_v0 = vld [vmem:[%s4882_s3 + $0x168] sm:$0xff] }
 0x437   : > { %3690 = vmatpush3.bf16.msra.mxu1 %v3689_v12  ;;  %3660 = vmatprep.subr.bf16.mxu0 %v3659_v9  ;;  %v2821_v12 = vld [vmem:[%s4882_s3 + $0x1f0] sm:$0xff]  ;;  %v3709_v6 = vpack.c.bf16 %v2804_v0, %v2803_v63  ;;  %v3679_v9 = vpack.c.bf16 %v2790_v38, %v2789_v24 }
 0x438   : > { %3692 = vmatprep.subr.bf16.mxu1 %v3691_v11  ;;  %v3711_v51 = vpack.c.bf16 %v2822_v13, %v2821_v12  ;;  %v2805_v11 = vld [vmem:[%s4882_s3 + $0x170] sm:$0xff] }
 0x43a   : > { %3662 = vmatpush3.bf16.msra.mxu0 %v3661_v22  ;;  %v2806_v22 = vld [vmem:[%s4882_s3 + $0x178] sm:$0xff] }
 0x43b   : > { %3694 = vmatpush3.bf16.msra.mxu1 %v3693_v14  ;;  %3664 = vmatprep.subr.bf16.mxu0 %v3663_v33  ;;  %v2976_v14 = vld [vmem:[%s4883_s4 + $0x18] sm:$0xff]  ;;  %v3713_v32 = vpack.c.bf16 %v2806_v22, %v2805_v11  ;;  %v3715_v33 = vpack.c.bf16 %v2978_v25, %v2974_v23 }
 0x43c   : > { %3696 = vmatprep.subr.bf16.mxu1 %v3695_v26  ;;  %v3719_v34 = vpack.c.bf16 %v2980_v31, %v2976_v14 }
 0x43e   : > { %3666 = vmatpush3.bf16.msra.mxu0 %v3665_v27 }
 0x43f   : > { %3698 = vmatpush3.bf16.msra.mxu1 %v3697_v18  ;;  %3668 = vmatprep.subr.bf16.mxu0 %v3667_v7 }
 0x440   : > { %3700 = vmatprep.subr.bf16.mxu1 %v3699_v44 }
 0x442   : > { %3670 = vmatpush3.bf16.msra.mxu0 %v3669_v28 }
 0x443   : > { %3702 = vmatpush3.bf16.msra.mxu1 %v3701_v20  ;;  %3672 = vmatprep.subr.bf16.mxu0 %v3671_v21 }
 0x444   : > { %3704 = vmatprep.subr.bf16.mxu1 %v3703_v49 }
 0x446   : > { %3674 = vmatpush3.bf16.msra.mxu0 %v3673_v55 }
 0x447   : > { %3706 = vmatpush3.bf16.msra.mxu1 %v3705_v1  ;;  %3676 = vmatprep.subr.bf16.mxu0 %v3675_v2 }
 0x448   : > { %3708 = vmatprep.subr.bf16.mxu1 %v3707_v62 }
 0x44a   : > { %3678 = vmatpush3.bf16.msra.mxu0 %v3677_v5 }
 0x44b   : > { %3710 = vmatpush3.bf16.msra.mxu1 %v3709_v6  ;;  %3680 = vmatprep.subr.bf16.mxu0 %v3679_v9 }
 0x44c   : > { %3712 = vmatprep.subr.bf16.mxu1 %v3711_v51 }
 0x44e   : > { %3682 = vmatpush3.bf16.msra.mxu0 %v3681_v15 }
 0x44f   : > { %3714 = vmatpush3.bf16.msra.mxu1 %v3713_v32  ;;  %3716 = vmatprep.subr.bf16.mxu0 %v3715_v33 }
 0x450   : > { %3720 = vmatprep.subr.bf16.mxu1 %v3719_v34 }
 0x4fa   : > { %v3509_v16 = vpop.f32.mrb[20].mxu0 }
 0x4fb   : > { %v2235_v17 = vpop.f32.mrb[21].mxu0 }
 0x4fe   : > { %v3516_v26 = vpop.f32.mrb[20].mxu1 }
 0x4ff   : > { %v2316_v27 = vpop.f32.mrb[21].mxu1 }
 0x504   : > { %v3523_v39 = vpop.f32.mrb[22].mxu0 }
 0x505   : > { %v2555_v40 = vcombine.low %v3509_v16, %v3523_v39  ;;  %v2556_v41 = vcombine.high %v3509_v16, %v3523_v39  ;;  %v2397_v18 = vpop.f32.mrb[23].mxu0  ;;  %v3530_v19 = vpop.f32.mrb[22].mxu1 }
 0x506   : > { %v2487_v42 = vcombine.low %v2235_v17, %v2397_v18  ;;  %v2488_v43 = vcombine.high %v2235_v17, %v2397_v18  ;;  %v2571_v7 = vcombine.low %v3516_v26, %v3530_v19  ;;  %v2572_v44 = vcombine.high %v3516_v26, %v3530_v19  ;;  %v2478_v8 = vpop.f32.mrb[23].mxu1 }
 0x507   : > { %v2503_v29 = vcombine.low %v2316_v27, %v2478_v8  ;;  %v2504_v30 = vcombine.high %v2316_v27, %v2478_v8  ;;  %v2563_v28 = vrot.slane %v2555_v40, %v4291_v46  ;;  %v2570_v35 = vrot.slane %v2556_v41, %v4291_v46  ;;  %v2979_v8 = vld [vmem:[%s4883_s4 + $0x30] sm:$0xff] }
 0x508   : > { %v2579_v36 = vrot.slane %v2571_v7, %v4291_v46  ;;  %v2586_v37 = vrot.slane %v2572_v44, %v4291_v46  ;;  %v2495_v20 = vrot.slane %v2487_v42, %v4291_v46  ;;  %v2502_v21 = vrot.slane %v2488_v43, %v4291_v46  ;;  %v2977_v7 = vld [vmem:[%s4883_s4 + $0x20] sm:$0xff]  ;;  %v2975_v44 = vld [vmem:[%s4883_s4 + $0x10] sm:$0xff] }
 0x509   : > { %v2511_v45 = vrot.slane %v2503_v29, %v4291_v46  ;;  %v2518_v47 = vrot.slane %v2504_v30, %v4291_v46 }
 0x50a   : > { %v2587_v48 = vcombine.low %v2563_v28, %v2579_v36  ;;  %v2588_v49 = vcombine.high %v2563_v28, %v2579_v36  ;;  %v2603_v52 = vcombine.low %v2570_v35, %v2586_v37  ;;  %v2604_v53 = vcombine.high %v2570_v35, %v2586_v37 }
 0x50b   : > { %v2519_v54 = vcombine.low %v2495_v20, %v2511_v45  ;;  %v2520_v55 = vcombine.high %v2495_v20, %v2511_v45  ;;  %v2535_v56 = vcombine.low %v2502_v21, %v2518_v47  ;;  %v2536_v57 = vcombine.high %v2502_v21, %v2518_v47  ;;  %v2982_v47 = vld [vmem:[%s4883_s4 + $0x48] sm:$0xff] }
 0x50c   : > { %v2595_v58 = vrot.slane %v2587_v48, %v4297_v61  ;;  %v2602_v1 = vrot.slane %v2588_v49, %v4297_v61  ;;  %v2611_v2 = vrot.slane %v2603_v52, %v4297_v61  ;;  %v2618_v3 = vrot.slane %v2604_v53, %v4297_v61  ;;  %v2984_v48 = vld [vmem:[%s4883_s4 + $0x58] sm:$0xff]  ;;  %v2981_v49 = vld [vmem:[%s4883_s4 + $0x40] sm:$0xff]  ;;  %v2983_v52 = vld [vmem:[%s4883_s4 + $0x50] sm:$0xff] }
 0x50d   : > { %v2527_v4 = vrot.slane %v2519_v54, %v4297_v61  ;;  %v2534_v60 = vrot.slane %v2520_v55, %v4297_v61  ;;  %v2543_v62 = vrot.slane %v2535_v56, %v4297_v61  ;;  %v2550_v63 = vrot.slane %v2536_v57, %v4297_v61 }
 0x50e   : > { %v2691_v0 = vcombine.low %v2595_v58, %v2602_v1  ;;  %v3278_v24 = vcombine.high %v2595_v58, %v2602_v1  ;;  %v2707_v38 = vcombine.low %v2611_v2, %v2618_v3  ;;  %v3279_v12 = vcombine.high %v2611_v2, %v2618_v3 }
 0x50f   : > { %v2623_v13 = vcombine.low %v2527_v4, %v2534_v60  ;;  %v3276_v5 = vcombine.high %v2527_v4, %v2534_v60  ;;  %v2639_v6 = vcombine.low %v2543_v62, %v2550_v63  ;;  %v3277_v9 = vcombine.high %v2543_v62, %v2550_v63 }
 0x510   : > { %v2698_v50 = vrot.slane %v2691_v0, %v4291_v46  ;;  %v2706_v10 = vrot.slane %v3278_v24, %v4291_v46  ;;  %v2714_v51 = vrot.slane %v2707_v38, %v4291_v46  ;;  %v2722_v11 = vrot.slane %v3279_v12, %v4291_v46 }
 0x511   : > { %v2630_v22 = vrot.slane %v2623_v13, %v4291_v46  ;;  %v2638_v23 = vrot.slane %v3276_v5, %v4291_v46  ;;  %v2646_v25 = vrot.slane %v2639_v6, %v4291_v46  ;;  %v2654_v14 = vrot.slane %v3277_v9, %v4291_v46  ;;  %v2973_v46 = vld [vmem:[%s4883_s4] sm:$0xff] }
 0x512   : > { %v2723_v15 = vcombine.low %v2698_v50, %v2706_v10  ;;  %v2739_v31 = vcombine.low %v2714_v51, %v2722_v11  ;;  %v2724_v32 = vcombine.high %v2698_v50, %v2706_v10  ;;  %v2740_v33 = vcombine.high %v2714_v51, %v2722_v11 }
 0x513   : > { %v2655_v34 = vcombine.low %v2630_v22, %v2638_v23  ;;  %v2671_v16 = vcombine.low %v2646_v25, %v2654_v14  ;;  %v2656_v17 = vcombine.high %v2630_v22, %v2638_v23  ;;  %v2672_v26 = vcombine.high %v2646_v25, %v2654_v14 }
 0x514   : > { %v2731_v27 = vrot.slane %v2723_v15, %v4297_v61  ;;  %v2747_v39 = vrot.slane %v2739_v31, %v4297_v61  ;;  %v2738_v40 = vrot.slane %v2724_v32, %v4297_v61  ;;  %v2754_v41 = vrot.slane %v2740_v33, %v4297_v61 }
 0x515   : > { %v2663_v18 = vrot.slane %v2655_v34, %v4297_v61  ;;  %v2679_v19 = vrot.slane %v2671_v16, %v4297_v61  ;;  %v2670_v42 = vrot.slane %v2656_v17, %v4297_v61  ;;  %v2686_v43 = vrot.slane %v2672_v26, %v4297_v61 }
 0x516   : > { %v2756_v29 = vcombine.high %v2731_v27, %v2747_v39  ;;  %v2758_v30 = vcombine.high %v2738_v40, %v2754_v41  ;;  %v2755_v28 = vcombine.low %v2731_v27, %v2747_v39  ;;  %v2757_v35 = vcombine.low %v2738_v40, %v2754_v41 }
 0x517   : > { %v2688_v36 = vcombine.high %v2663_v18, %v2679_v19  ;;  %v2690_v37 = vcombine.high %v2670_v42, %v2686_v43  ;;  %v2687_v20 = vcombine.low %v2663_v18, %v2679_v19  ;;  %v2689_v61 = vcombine.low %v2670_v42, %v2686_v43 }
 0x518   : > { %v3717_v21 = vpack.c.bf16 %v2977_v7, %v2973_v46  ;;  %v3721_v45 = vpack.c.bf16 %v2979_v8, %v2975_v44 }
 0x519   : > { %2887 = vmatprep.mubr.f32.mxu0 %v2688_v36  ;;  %2962 = vmatprep.mubr.f32.mxu1 %v2690_v37 }
 0x51a   : > { %2888 = vmatmul.mubr.f32.vlgmr.msra.gmra.mrb[24].mxu0 %v2687_v20  ;;  %2963 = vmatmul.mubr.f32.vlgmr.msra.gmra.mrb[24].mxu1 %v2689_v61 }
 0x51b   : > { %2892 = vmatprep.mubr.f32.mxu0 %v2756_v29  ;;  %2967 = vmatprep.mubr.f32.mxu1 %v2758_v30 }
 0x51c   : > { %3718 = vmatpush1.bf16.msra.mxu0 %v3717_v21  ;;  %3722 = vmatpush1.bf16.msra.mxu1 %v3721_v45 }
 0x51d   : > { %2995 = vmatprep.subr.mxu0 %v2982_v47  ;;  %3072 = vmatprep.subr.mxu1 %v2984_v48 }
 0x51e   : > { %2893 = vmatmul.mubr.f32.gmra.mrb[26].mxu0 %v2755_v28  ;;  %2968 = vmatmul.mubr.f32.gmra.mrb[26].mxu1 %v2757_v35 }
 0x51f   : > { %3055 = vmatprep.mubr.f32.mxu0 %v3863_v59  ;;  %3132 = vmatprep.mubr.f32.mxu1 %v3863_v59 }
 0x520   : > { %2996 = vmatpush1.msra.mxu0 %v2981_v49  ;;  %3073 = vmatpush1.msra.mxu1 %v2983_v52 }
 0x5ed   : > { %v3431_v53 = vpop.f32.mrb[24].mxu0  ;;  %v3469_v54 = vpop.f32.mrb[24].mxu1 }
 0x5ee   : > { %v3432_v55 = vpop.f32.mrb[25].mxu0  ;;  %v3470_v56 = vpop.f32.mrb[25].mxu1 }
 0x5ef   : > { %v3433_v57 = vadd.f32 %v3432_v55, %v3431_v53  ;;  %v3471_v58 = vadd.f32 %v3470_v56, %v3469_v54 }
 0x5f1   : > { %v2965_v1 = vadd.f32 %v3471_v58, %v3433_v57  ;;  %v3434_v2 = vpop.f32.mrb[26].mxu0  ;;  %v3472_v3 = vpop.f32.mrb[26].mxu1 }
 0x5f2   : > { %v3435_v4 = vpop.f32.mrb[27].mxu0  ;;  %v3473_v60 = vpop.f32.mrb[27].mxu1 }
 0x5f3   : > { %v3436_v62 = vadd.f32 %v3435_v4, %v3434_v2  ;;  %v3474_v63 = vadd.f32 %v3473_v60, %v3472_v3  ;;  %3280 = vmatmul.mubr.msk.f32.vlgmr.msra.gmra.mrb[28].mxu0 %vm481_vm0, %v2965_v1  ;;  %3282 = vmatmul.mubr.msk.f32.vlgmr.msra.gmra.mrb[28].mxu1 %vm481_vm0, %v2965_v1 }
 0x5f4   : > { %3061 = vmatprep.mubr.f32.mxu0 %v3863_v59  ;;  %3138 = vmatprep.mubr.f32.mxu1 %v3863_v59 }
 0x5f5   : > { %v2970_v0 = vadd.f32 %v3474_v63, %v3436_v62 }
 0x5f7   : > { %3281 = vmatmul.mubr.msk.f32.gmra.mrb[30].mxu0 %vm481_vm0, %v2970_v0  ;;  %3283 = vmatmul.mubr.msk.f32.gmra.mrb[30].mxu1 %vm481_vm0, %v2970_v0 }
 0x6c6   : > { %v3057_v24 = vpop.f32.mrb[28].mxu0  ;;  %v3134_v38 = vpop.f32.mrb[28].mxu1 }
 0x6c7   : > { %3145 = vst [vmem:[%s217_s17] sm:$0xff] %v3057_v24  ;;  %3147 = vst [vmem:[%s217_s17 + $0x10] sm:$0xff] %v3134_v38  ;;  %v3059_v12 = vpop.f32.mrb[29].mxu0  ;;  %v3136_v13 = vpop.f32.mrb[29].mxu1 }
 0x6c8   : > { %3146 = vst [vmem:[%s217_s17 + $0x8] sm:$0xff] %v3059_v12  ;;  %3148 = vst [vmem:[%s217_s17 + $0x18] sm:$0xff] %v3136_v13 }
 0x6ca   : > { %v3063_v59 = vpop.f32.mrb[30].mxu0  ;;  %v3140_v5 = vpop.f32.mrb[30].mxu1 }
 0x6cb   : > { %3149 = vst [vmem:[%s217_s17 + $0x20] sm:$0xff] %v3063_v59  ;;  %3151 = vst [vmem:[%s217_s17 + $0x30] sm:$0xff] %v3140_v5  ;;  %v3065_v6 = vpop.f32.mrb[31].mxu0  ;;  %v3142_v9 = vpop.f32.mrb[31].mxu1 }
 0x6cc   : > { %3150 = vst [vmem:[%s217_s17 + $0x28] sm:$0xff] %v3065_v6  ;;  %3152 = vst [vmem:[%s217_s17 + $0x38] sm:$0xff] %v3142_v9 }
 0x6cd   : > { %3812 = shalt.err (!%p3809_p3)
}
 0x6ce   : > { %s3813_s8 = scalar_lea.hbm %s4836_s14, 1024  ;;  %s3817_s11 = scalar_lea.hbm %s4884_s5, 2048 }
 0x6cf   : > { %p3814_p4 = scmp.ne.s32.totalorder %s4836_s14, %s3813_s8  ;;  %p3818_p9 = scmp.lt.u32.totalorder %s4836_s14, %s4884_s5 }
 0x6d0   : > { %p3819_p10 = scmp.lt.u32.totalorder %s3817_s11, %s3813_s8  ;;  %p3821_p12 = scmp.lt.u32.totalorder %s3813_s8, %s4836_s14 }
 0x6d1   : > { %p3815_p7 = pnand %p3814_p4, %p3937_p5 }
 0x6d2   : > { %p3820_p11 = por %p3819_p10, %p3818_p9 }
 0x6d3   : > { %p3816_p8 = pneg %p3815_p7 }
 0x6d4   : > { %p3822_p13 = por %p3821_p12, %p3820_p11 }
 0x6d6   : > { %p3823_p0 = pnand %p3822_p13, %p3816_p8 }
 0x6d8   : > { %3826 = shalt.err (!%p3823_p0)
}
 0x6d9   : > { %s3867_s17 = smov 512   ;;  %s3868_s25 = smov 32  }
 0x6da   : > { %3723 = dma.vmem_to_hbm [thread:$0]  (%p3937_p5), %s4831_s23, 1024, %s4836_s14, %s4838_s22, %s3867_s17, %s3867_s17, %s3868_s25  }
 0x6db PF: > { %p3729_p1 = scmp.ge.s32.totalorder %s3861_s21, 2  ;;  %s3182_s26 = sand.u32 1, %s3849_s18  }
 0x6dc   : > { %s3183_s30 = scalar_lea.sflag [#allocation3], %s3182_s26 }
 0x6dd   : > { %p3726_p2 = pnand %p3729_p1, %p3941_p6 }
 0x6df   : > { %3844 = dma.done.wait (!%p3726_p2), %s3183_s30, 1024  }
 0x6e0   : > { %3846 = vsyncadd (!%p3726_p2), %s3183_s30, 4294966272  ;;  %p15_p3 = scmp.ge.s32.totalorder %s3924_s24, 4   ;;  %s4887_s18 = smov %s3853_s19 }
 0x6e1   : > { %s4888_s19 = smov %s3857_s20  ;;  %s4889_s20 = smov %s3935_s27 }
 0x6e2   : > { %s4890_s21 = smov %s3924_s24  ;;  %17 = sbr.rel (!%p15_p3) target bundleno = 3 (0x3), region = 75 }
 0x6e9   :  { %3188 = vsyncpa [#allocation3], 1 }
 0x6ea   :  { %3190 = vsyncpa [#allocation3 + $0x1], 1 }

</bundles_post_ra>
